<compile_context>
chip_gen: v7x
topology: tpu7x:2x2x1
jax: 0.10.0
libtpu: 0.0.40
codegen_flags: <defaults>
</compile_context>

<pallas_src>
import functools

import jax
import jax.numpy as jnp
from jax import lax
from jax.experimental import pallas as pl
from jax.experimental.pallas import tpu as pltpu

BN_EPS = 1e-5
LANE = 128
SUBLANE = 8


def _round_up(x, m):
    return (x + m - 1) // m * m


def _conv_stats_kernel(p_ref, w_ref, g_ref, be_ref, conv_ref, ab_ref,
                       sum_ref, ssq_ref, *, m_total):
    # p_ref   : (tm, K_pad)     im2col patches tile
    # w_ref   : (K_pad, O_pad)  conv weight (resident)
    # g_ref   : (1, O_pad)      BN gamma
    # be_ref  : (1, O_pad)      BN beta
    # conv_ref: (tm, O_pad)     conv output tile (f32)
    # ab_ref  : (2, O_pad)      folded BN affine [a; c] (written at last step)
    # sum_ref/ssq_ref: (1, O_pad) VMEM scratch accumulators (persist across grid)
    i = pl.program_id(0)

    @pl.when(i == 0)
    def _init():
        sum_ref[...] = jnp.zeros_like(sum_ref)
        ssq_ref[...] = jnp.zeros_like(ssq_ref)

    acc = jnp.dot(p_ref[...], w_ref[...], preferred_element_type=jnp.float32)
    conv_ref[...] = acc
    # Padded M rows are exactly zero (zero patches, no bias) -> contribute 0 to both sums.
    sum_ref[...] += jnp.sum(acc, axis=0, keepdims=True)
    ssq_ref[...] += jnp.sum(acc * acc, axis=0, keepdims=True)

    @pl.when(i == pl.num_programs(0) - 1)
    def _finalize():
        inv_m = jnp.float32(1.0 / m_total)           # divide by the TRUE row count
        mean = sum_ref[...] * inv_m
        var = ssq_ref[...] * inv_m - mean * mean     # biased variance (PyTorch BN stats)
        a = g_ref[...] * lax.rsqrt(var + BN_EPS)
        c = be_ref[...] - mean * a
        ab_ref[0:1, :] = a
        ab_ref[1:2, :] = c


def _bn_relu_kernel(conv_ref, ab_ref, o_ref):
    a = ab_ref[0:1, :]
    c = ab_ref[1:2, :]
    o_ref[...] = jnp.maximum(conv_ref[...] * a + c, 0.0)


def _im2col_nhwc(x_nhwc, kh, kw, stride, padding, k_pad):
    # NHWC slices concatenated along channels: per-patch flatten order is (kh, kw, c).
    n, h, w, c = x_nhwc.shape
    oh = (h + 2 * padding - kh) // stride + 1
    ow = (w + 2 * padding - kw) // stride + 1
    xp = jnp.pad(x_nhwc, ((0, 0), (padding, padding), (padding, padding), (0, 0)))
    cols = [
        xp[:, i:i + stride * oh:stride, j:j + stride * ow:stride, :]
        for i in range(kh) for j in range(kw)
    ]
    patches = jnp.concatenate(cols, axis=-1).reshape(n * oh * ow, kh * kw * c)
    if k_pad > kh * kw * c:
        patches = jnp.pad(patches, ((0, 0), (0, k_pad - kh * kw * c)))
    return patches, oh, ow


@functools.partial(jax.jit,
                   static_argnames=("stride", "padding", "block_m", "matmul_dtype"))
def conv_block_forward(x, weight, bias, gamma, beta, *, stride=1, padding=0,
                       block_m=512, matmul_dtype=None):
    """x: (N, C_in, H, W), weight: (C_out, C_in, kH, kW). Returns (N, C_out, OH, OW)."""
    # Conv bias is mathematically cancelled by training-mode BN's mean subtraction.
    del bias
    n = x.shape[0]
    c_out, c_in, kh, kw = weight.shape

    x_nhwc = jnp.transpose(x, (0, 2, 3, 1))
    k = c_in * kh * kw
    k_pad = _round_up(k, SUBLANE)
    o_pad = _round_up(c_out, LANE)

    patches, oh, ow = _im2col_nhwc(x_nhwc, kh, kw, stride, padding, k_pad)
    m = n * oh * ow
    tm = min(block_m, _round_up(m, SUBLANE))
    m_pad = _round_up(m, tm)
    if m_pad > m:
        patches = jnp.pad(patches, ((0, m_pad - m), (0, 0)))

    # (O, C, kH, kW) -> (kH, kW, C, O) -> (K, O): matches the NHWC im2col flatten order.
    w2d = jnp.transpose(weight, (2, 3, 1, 0)).reshape(k, c_out)
    w2d = jnp.pad(w2d, ((0, k_pad - k), (0, o_pad - c_out)))
    g2d = jnp.pad(gamma.reshape(1, c_out), ((0, 0), (0, o_pad - c_out)))
    be2d = jnp.pad(beta.reshape(1, c_out), ((0, 0), (0, o_pad - c_out)))

    if matmul_dtype is not None:   # bf16 MXU operands (v5e/v6e); BN math stays f32.
        patches = patches.astype(matmul_dtype)
        w2d = w2d.astype(matmul_dtype)

    num_m_tiles = m_pad // tm
    itemsize = patches.dtype.itemsize
    cost = pl.CostEstimate(
        flops=2 * m_pad * k_pad * o_pad,
        transcendentals=0,
        bytes_accessed=(m_pad * k_pad * itemsize + k_pad * o_pad * itemsize
                        + m_pad * o_pad * 4))

    # Pass 1: conv matmul + BN statistics (reduction over M -> "arbitrary" axis).
    conv_out, ab = pl.pallas_call(
        functools.partial(_conv_stats_kernel, m_total=m),
        out_shape=(jax.ShapeDtypeStruct((m_pad, o_pad), jnp.float32),
                   jax.ShapeDtypeStruct((2, o_pad), jnp.float32)),
        grid_spec=pltpu.PrefetchScalarGridSpec(
            num_scalar_prefetch=0,
            grid=(num_m_tiles,),
            in_specs=[
                pl.BlockSpec((tm, k_pad), lambda i: (i, 0)),
                pl.BlockSpec((k_pad, o_pad), lambda i: (0, 0)),
                pl.BlockSpec((1, o_pad), lambda i: (0, 0)),
                pl.BlockSpec((1, o_pad), lambda i: (0, 0)),
            ],
            out_specs=(
                pl.BlockSpec((tm, o_pad), lambda i: (i, 0)),
                pl.BlockSpec((2, o_pad), lambda i: (0, 0)),
            ),
            scratch_shapes=[pltpu.VMEM((1, o_pad), jnp.float32),
                            pltpu.VMEM((1, o_pad), jnp.float32)],
        ),
        compiler_params=pltpu.CompilerParams(
            dimension_semantics=("arbitrary",),
            vmem_limit_bytes=32 * 1024 * 1024),
        cost_estimate=cost,
    )(patches, w2d, g2d, be2d)

    # Pass 2: fused normalize + ReLU, one FMA pass, parallel M tiles (megacore on v7x).
    out = pl.pallas_call(
        _bn_relu_kernel,
        out_shape=jax.ShapeDtypeStruct((m_pad, o_pad), jnp.float32),
        grid_spec=pltpu.PrefetchScalarGridSpec(
            num_scalar_prefetch=0,
            grid=(num_m_tiles,),
            in_specs=[
                pl.BlockSpec((tm, o_pad), lambda i: (i, 0)),
                pl.BlockSpec((2, o_pad), lambda i: (0, 0)),
            ],
            out_specs=pl.BlockSpec((tm, o_pad), lambda i: (i, 0)),
        ),
        compiler_params=pltpu.CompilerParams(
            dimension_semantics=("parallel",),
            vmem_limit_bytes=32 * 1024 * 1024),
    )(conv_out, ab)

    out = out[:m, :c_out].reshape(n, oh, ow, c_out)
    # NCHW to match the PyTorch module's output layout.
    # TODO(synk): NHWC consumers could skip this final transpose entirely.
    return jnp.transpose(out, (0, 3, 1, 2))


def _reference(x, weight, bias, gamma, beta, stride, padding):
    y = lax.conv_general_dilated(
        x, weight, window_strides=(stride, stride),
        padding=[(padding, padding), (padding, padding)],
        dimension_numbers=("NCHW", "OIHW", "NCHW"))
    y = y + bias[None, :, None, None]
    mean = jnp.mean(y, axis=(0, 2, 3), keepdims=True)
    var = jnp.mean((y - mean) ** 2, axis=(0, 2, 3), keepdims=True)
    y = (y - mean) * lax.rsqrt(var + BN_EPS)
    y = y * gamma[None, :, None, None] + beta[None, :, None, None]
    return jnp.maximum(y, 0.0)


if __name__ == "__main__":
    # ConvBlock(in_channels=4, out_channels=8, kernel_size=3, stride=1, padding=1)
    in_channels, out_channels, ksize, stride, padding = 4, 8, 3, 1, 1
    N, H, W = 2, 16, 16

    key = jax.random.PRNGKey(0)
    kx, kw_, kb = jax.random.split(key, 3)

    x = jax.random.normal(kx, (N, in_channels, H, W), dtype=jnp.float32)

    fan_in = in_channels * ksize * ksize
    bound = 1.0 / (fan_in ** 0.5)
    weight = jax.random.uniform(kw_, (out_channels, in_channels, ksize, ksize),
                                minval=-bound, maxval=bound, dtype=jnp.float32)
    bias = jax.random.uniform(kb, (out_channels,), minval=-bound, maxval=bound,
                              dtype=jnp.float32)
    gamma = jnp.ones((out_channels,), jnp.float32)
    beta = jnp.zeros((out_channels,), jnp.float32)

    out = conv_block_forward(x, weight, bias, gamma, beta,
                             stride=stride, padding=padding)
    out = jax.block_until_ready(out)

    ref = _reference(x, weight, bias, gamma, beta, stride, padding)
    assert out.shape == (N, out_channels, H, W), out.shape
    err = float(jnp.max(jnp.abs(out - ref)))
    assert jnp.allclose(out, ref, atol=2e-4, rtol=2e-4), err

    print("KERNEL_OK")
</pallas_src>

<mosaic_0001>
module attributes {stable_mosaic.version = 11 : i64} {
  func.func @_bn_relu_kernel(%arg0: i32, %arg1: memref<512x128xf32, #tpu.memory_space<vmem>>, %arg2: memref<2x128xf32, #tpu.memory_space<vmem>>, %arg3: memref<512x128xf32, #tpu.memory_space<vmem>>) attributes {dimension_semantics = [#tpu.dimension_semantics<parallel>], iteration_bounds = array<i64: 1>, scalar_prefetch = 0 : i64, scratch_operands = 0 : i64, tpu.core_type = #tpu.core_type<tc>, window_params = [{transform_indices = @transform_0, window_bounds = array<i64: 512, 128>}, {pipeline_mode = #tpu.pipeline_mode<synchronous>, transform_indices = @transform_1, window_bounds = array<i64: 2, 128>}, {transform_indices = @transform_2, window_bounds = array<i64: 512, 128>}]} {
    %c0 = arith.constant 0 : index
    %c0_0 = arith.constant 0 : index
    %0 = vector.load %arg2[%c0, %c0_0] : memref<2x128xf32, #tpu.memory_space<vmem>>, vector<1x128xf32>
    %c1 = arith.constant 1 : index
    %c0_1 = arith.constant 0 : index
    %1 = vector.load %arg2[%c1, %c0_1] : memref<2x128xf32, #tpu.memory_space<vmem>>, vector<1x128xf32>
    %c0_2 = arith.constant 0 : index
    %c0_3 = arith.constant 0 : index
    %2 = vector.load %arg1[%c0_2, %c0_3] : memref<512x128xf32, #tpu.memory_space<vmem>>, vector<512x128xf32>
    %3 = vector.broadcast %0 : vector<1x128xf32> to vector<512x128xf32>
    %4 = arith.mulf %2, %3 : vector<512x128xf32>
    %5 = vector.broadcast %1 : vector<1x128xf32> to vector<512x128xf32>
    %6 = arith.addf %4, %5 : vector<512x128xf32>
    %cst = arith.constant 0.000000e+00 : f32
    %7 = vector.broadcast %cst : f32 to vector<512x128xf32>
    %8 = arith.maximumf %6, %7 : vector<512x128xf32>
    %c0_4 = arith.constant 0 : index
    %c0_5 = arith.constant 0 : index
    %9 = vector.load %arg3[%c0_4, %c0_5] : memref<512x128xf32, #tpu.memory_space<vmem>>, vector<512x128xf32>
    tpu.vector_store %arg3[%c0_4, %c0_5], %8 {strides = array<i32>} : memref<512x128xf32, #tpu.memory_space<vmem>>, vector<512x128xf32>,
    return
  }
  func.func @transform_0(%arg0: i32) -> (i32, i32) {
    %c0_i32 = arith.constant 0 : i32
    %c0_i32_0 = arith.constant 0 : i32
    return %arg0, %c0_i32 : i32, i32
  }
  func.func @transform_1(%arg0: i32) -> (i32, i32) {
    %c0_i32 = arith.constant 0 : i32
    %c0_i32_0 = arith.constant 0 : i32
    %c0_i32_1 = arith.constant 0 : i32
    return %c0_i32, %c0_i32_0 : i32, i32
  }
  func.func @transform_2(%arg0: i32) -> (i32, i32) {
    %c0_i32 = arith.constant 0 : i32
    %c0_i32_0 = arith.constant 0 : i32
    return %arg0, %c0_i32 : i32, i32
  }
}

module attributes {stable_mosaic.version = 11 : i64} {
  func.func @_conv_stats_kernel(%arg0: i32, %arg1: memref<512x40xf32, #tpu.memory_space<vmem>>, %arg2: memref<40x128xf32, #tpu.memory_space<vmem>>, %arg3: memref<1x128xf32, #tpu.memory_space<vmem>>, %arg4: memref<1x128xf32, #tpu.memory_space<vmem>>, %arg5: memref<512x128xf32, #tpu.memory_space<vmem>>, %arg6: memref<2x128xf32, #tpu.memory_space<vmem>>, %arg7: memref<1x128xf32, #tpu.memory_space<vmem>>, %arg8: memref<1x128xf32, #tpu.memory_space<vmem>>) attributes {dimension_semantics = [#tpu.dimension_semantics<arbitrary>], iteration_bounds = array<i64: 1>, scalar_prefetch = 0 : i64, scratch_operands = 2 : i64, tpu.core_type = #tpu.core_type<tc>, window_params = [{transform_indices = @transform_0, window_bounds = array<i64: 512, 40>}, {pipeline_mode = #tpu.pipeline_mode<synchronous>, transform_indices = @transform_1, window_bounds = array<i64: 40, 128>}, {pipeline_mode = #tpu.pipeline_mode<synchronous>, transform_indices = @transform_2, window_bounds = array<i64: 1, 128>}, {pipeline_mode = #tpu.pipeline_mode<synchronous>, transform_indices = @transform_3, window_bounds = array<i64: 1, 128>}, {transform_indices = @transform_4, window_bounds = array<i64: 512, 128>}, {pipeline_mode = #tpu.pipeline_mode<synchronous>, transform_indices = @transform_5, window_bounds = array<i64: 2, 128>}]} {
    %c0_i32 = arith.constant 0 : i32
    %0 = arith.cmpi eq, %arg0, %c0_i32 : i32
    %1 = arith.extui %0 : i1 to i32
    %c0_i32_0 = arith.constant 0 : i32
    %2 = arith.cmpi ne, %1, %c0_i32_0 : i32
    scf.if %2 {
      %cst_18 = arith.constant 0.000000e+00 : f32
      %21 = vector.broadcast %cst_18 : f32 to vector<1x128xf32>
      %c0_19 = arith.constant 0 : index
      %c0_20 = arith.constant 0 : index
      %22 = vector.load %arg7[%c0_19, %c0_20] : memref<1x128xf32, #tpu.memory_space<vmem>>, vector<1x128xf32>
      tpu.vector_store %arg7[%c0_19, %c0_20], %21 {strides = array<i32>} : memref<1x128xf32, #tpu.memory_space<vmem>>, vector<1x128xf32>,
      %cst_21 = arith.constant 0.000000e+00 : f32
      %23 = vector.broadcast %cst_21 : f32 to vector<1x128xf32>
      %c0_22 = arith.constant 0 : index
      %c0_23 = arith.constant 0 : index
      %24 = vector.load %arg8[%c0_22, %c0_23] : memref<1x128xf32, #tpu.memory_space<vmem>>, vector<1x128xf32>
      tpu.vector_store %arg8[%c0_22, %c0_23], %23 {strides = array<i32>} : memref<1x128xf32, #tpu.memory_space<vmem>>, vector<1x128xf32>,
    } else {
    }
    %c0 = arith.constant 0 : index
    %c0_1 = arith.constant 0 : index
    %3 = vector.load %arg1[%c0, %c0_1] : memref<512x40xf32, #tpu.memory_space<vmem>>, vector<512x40xf32>
    %c0_2 = arith.constant 0 : index
    %c0_3 = arith.constant 0 : index
    %4 = vector.load %arg2[%c0_2, %c0_3] : memref<40x128xf32, #tpu.memory_space<vmem>>, vector<40x128xf32>
    %cst = arith.constant dense<0.000000e+00> : vector<512x128xf32>
    %5 = tpu.matmul %3, %4, %cst {dimension_numbers = #tpu.dot_dimension_numbers<[1], [0], [0], [1], [0, 0, 1, 1], [], []>} : vector<512x40xf32>, vector<40x128xf32>, vector<512x128xf32> -> vector<512x128xf32>
    %c0_4 = arith.constant 0 : index
    %c0_5 = arith.constant 0 : index
    %6 = vector.load %arg5[%c0_4, %c0_5] : memref<512x128xf32, #tpu.memory_space<vmem>>, vector<512x128xf32>
    tpu.vector_store %arg5[%c0_4, %c0_5], %5 {strides = array<i32>} : memref<512x128xf32, #tpu.memory_space<vmem>>, vector<512x128xf32>,
    %c0_6 = arith.constant 0 : index
    %c0_7 = arith.constant 0 : index
    %7 = vector.load %arg7[%c0_6, %c0_7] : memref<1x128xf32, #tpu.memory_space<vmem>>, vector<1x128xf32>
    %cst_8 = arith.constant dense<0.000000e+00> : vector<128xf32>
    %8 = vector.multi_reduction <add>, %5, %cst_8 [0] : vector<512x128xf32> to vector<128xf32>
    %9 = vector.shape_cast %8 : vector<128xf32> to vector<1x128xf32>
    %10 = arith.addf %7, %9 : vector<1x128xf32>
    %c0_9 = arith.constant 0 : index
    %c0_10 = arith.constant 0 : index
    %11 = vector.load %arg7[%c0_9, %c0_10] : memref<1x128xf32, #tpu.memory_space<vmem>>, vector<1x128xf32>
    tpu.vector_store %arg7[%c0_9, %c0_10], %10 {strides = array<i32>} : memref<1x128xf32, #tpu.memory_space<vmem>>, vector<1x128xf32>,
    %c0_11 = arith.constant 0 : index
    %c0_12 = arith.constant 0 : index
    %12 = vector.load %arg8[%c0_11, %c0_12] : memref<1x128xf32, #tpu.memory_space<vmem>>, vector<1x128xf32>
    %13 = arith.mulf %5, %5 : vector<512x128xf32>
    %cst_13 = arith.constant dense<0.000000e+00> : vector<128xf32>
    %14 = vector.multi_reduction <add>, %13, %cst_13 [0] : vector<512x128xf32> to vector<128xf32>
    %15 = vector.shape_cast %14 : vector<128xf32> to vector<1x128xf32>
    %16 = arith.addf %12, %15 : vector<1x128xf32>
    %c0_14 = arith.constant 0 : index
    %c0_15 = arith.constant 0 : index
    %17 = vector.load %arg8[%c0_14, %c0_15] : memref<1x128xf32, #tpu.memory_space<vmem>>, vector<1x128xf32>
    tpu.vector_store %arg8[%c0_14, %c0_15], %16 {strides = array<i32>} : memref<1x128xf32, #tpu.memory_space<vmem>>, vector<1x128xf32>,
    %c0_i32_16 = arith.constant 0 : i32
    %18 = arith.cmpi eq, %arg0, %c0_i32_16 : i32
    %19 = arith.extui %18 : i1 to i32
    %c0_i32_17 = arith.constant 0 : i32
    %20 = arith.cmpi ne, %19, %c0_i32_17 : i32
    scf.if %20 {
      %c0_18 = arith.constant 0 : index
      %c0_19 = arith.constant 0 : index
      %21 = vector.load %arg7[%c0_18, %c0_19] : memref<1x128xf32, #tpu.memory_space<vmem>>, vector<1x128xf32>
      %cst_20 = arith.constant 0.001953125 : f32
      %22 = vector.broadcast %cst_20 : f32 to vector<1x128xf32>
      %23 = arith.mulf %21, %22 : vector<1x128xf32>
      %c0_21 = arith.constant 0 : index
      %c0_22 = arith.constant 0 : index
      %24 = vector.load %arg8[%c0_21, %c0_22] : memref<1x128xf32, #tpu.memory_space<vmem>>, vector<1x128xf32>
      %cst_23 = arith.constant 0.001953125 : f32
      %25 = vector.broadcast %cst_23 : f32 to vector<1x128xf32>
      %26 = arith.mulf %24, %25 : vector<1x128xf32>
      %27 = arith.mulf %23, %23 : vector<1x128xf32>
      %28 = arith.subf %26, %27 : vector<1x128xf32>
      %c0_24 = arith.constant 0 : index
      %c0_25 = arith.constant 0 : index
      %29 = vector.load %arg3[%c0_24, %c0_25] : memref<1x128xf32, #tpu.memory_space<vmem>>, vector<1x128xf32>
      %cst_26 = arith.constant 9.99999974E-6 : f32
      %30 = vector.broadcast %cst_26 : f32 to vector<1x128xf32>
      %31 = arith.addf %28, %30 : vector<1x128xf32>
      %32 = math.rsqrt %31 : vector<1x128xf32>
      %33 = arith.mulf %29, %32 : vector<1x128xf32>
      %c0_27 = arith.constant 0 : index
      %c0_28 = arith.constant 0 : index
      %34 = vector.load %arg4[%c0_27, %c0_28] : memref<1x128xf32, #tpu.memory_space<vmem>>, vector<1x128xf32>
      %35 = arith.mulf %23, %33 : vector<1x128xf32>
      %36 = arith.subf %34, %35 : vector<1x128xf32>
      %c0_29 = arith.constant 0 : index
      %c0_30 = arith.constant 0 : index
      %37 = vector.load %arg6[%c0_29, %c0_30] : memref<2x128xf32, #tpu.memory_space<vmem>>, vector<1x128xf32>
      tpu.vector_store %arg6[%c0_29, %c0_30], %33 {strides = array<i32>} : memref<2x128xf32, #tpu.memory_space<vmem>>, vector<1x128xf32>,
      %c1 = arith.constant 1 : index
      %c0_31 = arith.constant 0 : index
      %38 = vector.load %arg6[%c1, %c0_31] : memref<2x128xf32, #tpu.memory_space<vmem>>, vector<1x128xf32>
      tpu.vector_store %arg6[%c1, %c0_31], %36 {strides = array<i32>} : memref<2x128xf32, #tpu.memory_space<vmem>>, vector<1x128xf32>,
    } else {
    }
    return
  }
  func.func @transform_0(%arg0: i32) -> (i32, i32) {
    %c0_i32 = arith.constant 0 : i32
    %c0_i32_0 = arith.constant 0 : i32
    return %arg0, %c0_i32 : i32, i32
  }
  func.func @transform_1(%arg0: i32) -> (i32, i32) {
    %c0_i32 = arith.constant 0 : i32
    %c0_i32_0 = arith.constant 0 : i32
    %c0_i32_1 = arith.constant 0 : i32
    return %c0_i32, %c0_i32_0 : i32, i32
  }
  func.func @transform_2(%arg0: i32) -> (i32, i32) {
    %c0_i32 = arith.constant 0 : i32
    %c0_i32_0 = arith.constant 0 : i32
    %c0_i32_1 = arith.constant 0 : i32
    return %c0_i32, %c0_i32_0 : i32, i32
  }
  func.func @transform_3(%arg0: i32) -> (i32, i32) {
    %c0_i32 = arith.constant 0 : i32
    %c0_i32_0 = arith.constant 0 : i32
    %c0_i32_1 = arith.constant 0 : i32
    return %c0_i32, %c0_i32_0 : i32, i32
  }
  func.func @transform_4(%arg0: i32) -> (i32, i32) {
    %c0_i32 = arith.constant 0 : i32
    %c0_i32_0 = arith.constant 0 : i32
    return %arg0, %c0_i32 : i32, i32
  }
  func.func @transform_5(%arg0: i32) -> (i32, i32) {
    %c0_i32 = arith.constant 0 : i32
    %c0_i32_0 = arith.constant 0 : i32
    %c0_i32_1 = arith.constant 0 : i32
    return %c0_i32, %c0_i32_0 : i32, i32
  }
}

</mosaic_0001>

<bundles_post_ra>
// kernel: conv_block_forward.3
= control target key start
LH: loop header
LB: loop body
LE: loop exit
PB: predicated region body
PF: predicated region fallthrough
CT: control target
= control target key end

     0   :  { %s884_s0 = inlined_call_operand.vmem [shape: f32[512,128], index: 0, kind: input, shape index: {}]   ;;  %s885_s1 = inlined_call_operand.vmem [shape: f32[2,128], index: 1, kind: input, shape index: {}]   ;;  %s886_s2 = inlined_call_operand.vmem [shape: f32[512,128], index: 2, kind: output, shape index: {}]  }
   0x1   :  { %v365_v0 = vld [vmem:[%s885_s1] ss:$0 sm:$0xff]  ;;  %v370_v1 = vld [vmem:[%s885_s1 + $0x1] ss:$0 sm:$0xff]  ;;  %v14_v4 = vld [vmem:[%s884_s0 + $0x8] sm:$0xff] }
   0x2   :  { %v13_v2 = vld [vmem:[%s884_s0] sm:$0xff]  ;;  %v15_v5 = vld [vmem:[%s884_s0 + $0x10] sm:$0xff]  ;;  %v16_v6 = vld [vmem:[%s884_s0 + $0x18] sm:$0xff]  ;;  %v82_v7 = vmul.f32 %v365_v0, %v14_v4 }
   0x3   :  { %v81_v3 = vmul.f32 %v365_v0, %v13_v2  ;;  %v83_v8 = vmul.f32 %v365_v0, %v15_v5  ;;  %v84_v9 = vmul.f32 %v365_v0, %v16_v6  ;;  %v17_v10 = vld [vmem:[%s884_s0 + $0x20] sm:$0xff]  ;;  %v18_v11 = vld [vmem:[%s884_s0 + $0x28] sm:$0xff]  ;;  %v19_v12 = vld [vmem:[%s884_s0 + $0x30] sm:$0xff] }
   0x4   :  { %v85_v14 = vmul.f32 %v365_v0, %v17_v10  ;;  %v86_v15 = vmul.f32 %v365_v0, %v18_v11  ;;  %v87_v16 = vmul.f32 %v365_v0, %v19_v12  ;;  %v20_v17 = vld [vmem:[%s884_s0 + $0x38] sm:$0xff]  ;;  %v150_v18 = vadd.f32 %v370_v1, %v82_v7  ;;  %v21_v22 = vld [vmem:[%s884_s0 + $0x40] sm:$0xff]  ;;  %v22_v27 = vld [vmem:[%s884_s0 + $0x48] sm:$0xff] }
   0x5   :  { %v149_v13 = vadd.f32 %v370_v1, %v81_v3  ;;  %v151_v19 = vadd.f32 %v370_v1, %v83_v8  ;;  %v152_v20 = vadd.f32 %v370_v1, %v84_v9  ;;  %v88_v21 = vmul.f32 %v365_v0, %v20_v17  ;;  %v23_v28 = vld [vmem:[%s884_s0 + $0x50] sm:$0xff]  ;;  %v24_v29 = vld [vmem:[%s884_s0 + $0x58] sm:$0xff]  ;;  %v25_v34 = vld [vmem:[%s884_s0 + $0x60] sm:$0xff] }
   0x6   :  { %v153_v24 = vadd.f32 %v370_v1, %v85_v14  ;;  %v154_v25 = vadd.f32 %v370_v1, %v86_v15  ;;  %v155_v26 = vadd.f32 %v370_v1, %v87_v16  ;;  %v214_v30 = vmax.f32 %v150_v18, 0.0  ;;  %v26_v35 = vld [vmem:[%s884_s0 + $0x68] sm:$0xff]  ;;  %v27_v36 = vld [vmem:[%s884_s0 + $0x70] sm:$0xff]  ;;  %v28_v41 = vld [vmem:[%s884_s0 + $0x78] sm:$0xff] }
   0x7   :  { %v213_v23 = vmax.f32 %v149_v13, 0.0  ;;  %v215_v31 = vmax.f32 %v151_v19, 0.0  ;;  %v216_v32 = vmax.f32 %v152_v20, 0.0  ;;  %v156_v33 = vadd.f32 %v370_v1, %v88_v21  ;;  %v29_v54 = vld [vmem:[%s884_s0 + $0x80] sm:$0xff]  ;;  %v30_v59 = vld [vmem:[%s884_s0 + $0x88] sm:$0xff]  ;;  %v31_v60 = vld [vmem:[%s884_s0 + $0x90] sm:$0xff] }
   0x8   :  { %v217_v37 = vmax.f32 %v153_v24, 0.0  ;;  %v218_v38 = vmax.f32 %v154_v25, 0.0  ;;  %v219_v39 = vmax.f32 %v155_v26, 0.0  ;;  %v89_v40 = vmul.f32 %v365_v0, %v21_v22  ;;  %278 = vst [vmem:[%s886_s2 + $0x8] sm:$0xff] %v214_v30  ;;  %v32_v61 = vld [vmem:[%s884_s0 + $0x98] sm:$0xff]  ;;  %v33_v4 = vld [vmem:[%s884_s0 + $0xa0] sm:$0xff] }
   0x9   :  { %277 = vst [vmem:[%s886_s2] sm:$0xff] %v213_v23  ;;  %279 = vst [vmem:[%s886_s2 + $0x10] sm:$0xff] %v215_v31  ;;  %v220_v42 = vmax.f32 %v156_v33, 0.0  ;;  %v90_v43 = vmul.f32 %v365_v0, %v22_v27  ;;  %v91_v44 = vmul.f32 %v365_v0, %v23_v28  ;;  %v92_v45 = vmul.f32 %v365_v0, %v24_v29  ;;  %v34_v5 = vld [vmem:[%s884_s0 + $0xa8] sm:$0xff]  ;;  %v35_v6 = vld [vmem:[%s884_s0 + $0xb0] sm:$0xff] }
   0xa   :  { %280 = vst [vmem:[%s886_s2 + $0x18] sm:$0xff] %v216_v32  ;;  %281 = vst [vmem:[%s886_s2 + $0x20] sm:$0xff] %v217_v37  ;;  %v157_v46 = vadd.f32 %v370_v1, %v89_v40  ;;  %v93_v47 = vmul.f32 %v365_v0, %v25_v34  ;;  %v94_v48 = vmul.f32 %v365_v0, %v26_v35  ;;  %v36_v11 = vld [vmem:[%s884_s0 + $0xb8] sm:$0xff]  ;;  %v37_v24 = vld [vmem:[%s884_s0 + $0xc0] sm:$0xff] }
   0xb   :  { %282 = vst [vmem:[%s886_s2 + $0x28] sm:$0xff] %v218_v38  ;;  %283 = vst [vmem:[%s886_s2 + $0x30] sm:$0xff] %v219_v39  ;;  %v95_v49 = vmul.f32 %v365_v0, %v27_v36  ;;  %v158_v50 = vadd.f32 %v370_v1, %v90_v43  ;;  %v159_v51 = vadd.f32 %v370_v1, %v91_v44  ;;  %v38_v29 = vld [vmem:[%s884_s0 + $0xc8] sm:$0xff]  ;;  %v39_v30 = vld [vmem:[%s884_s0 + $0xd0] sm:$0xff] }
   0xc   :  { %284 = vst [vmem:[%s886_s2 + $0x38] sm:$0xff] %v220_v42  ;;  %v160_v52 = vadd.f32 %v370_v1, %v92_v45  ;;  %v96_v53 = vmul.f32 %v365_v0, %v28_v41  ;;  %v221_v55 = vmax.f32 %v157_v46, 0.0  ;;  %v161_v56 = vadd.f32 %v370_v1, %v93_v47  ;;  %v40_v31 = vld [vmem:[%s884_s0 + $0xd8] sm:$0xff]  ;;  %v41_v36 = vld [vmem:[%s884_s0 + $0xe0] sm:$0xff]  ;;  %v42_v37 = vld [vmem:[%s884_s0 + $0xe8] sm:$0xff] }
   0xd   :  { %v162_v57 = vadd.f32 %v370_v1, %v94_v48  ;;  %v163_v58 = vadd.f32 %v370_v1, %v95_v49  ;;  %v222_v62 = vmax.f32 %v158_v50, 0.0  ;;  %v223_v63 = vmax.f32 %v159_v51, 0.0  ;;  %v43_v38 = vld [vmem:[%s884_s0 + $0xf0] sm:$0xff]  ;;  %v44_v43 = vld [vmem:[%s884_s0 + $0xf8] sm:$0xff] }
   0xe   :  { %v224_v2 = vmax.f32 %v160_v52, 0.0  ;;  %v164_v3 = vadd.f32 %v370_v1, %v96_v53  ;;  %285 = vst [vmem:[%s886_s2 + $0x40] sm:$0xff] %v221_v55  ;;  %v225_v7 = vmax.f32 %v161_v56, 0.0  ;;  %v97_v10 = vmul.f32 %v365_v0, %v29_v54  ;;  %v45_v56 = vld [vmem:[%s884_s0 + $0x100] sm:$0xff] }
   0xf   :  { %v226_v8 = vmax.f32 %v162_v57, 0.0  ;;  %v227_v9 = vmax.f32 %v163_v58, 0.0  ;;  %286 = vst [vmem:[%s886_s2 + $0x48] sm:$0xff] %v222_v62  ;;  %287 = vst [vmem:[%s886_s2 + $0x50] sm:$0xff] %v223_v63  ;;  %v98_v13 = vmul.f32 %v365_v0, %v30_v59  ;;  %v99_v14 = vmul.f32 %v365_v0, %v31_v60  ;;  %v47_v62 = vld [vmem:[%s884_s0 + $0x110] sm:$0xff]  ;;  %v48_v63 = vld [vmem:[%s884_s0 + $0x118] sm:$0xff] }
  0x10   :  { %288 = vst [vmem:[%s886_s2 + $0x58] sm:$0xff] %v224_v2  ;;  %v228_v12 = vmax.f32 %v164_v3, 0.0  ;;  %v100_v15 = vmul.f32 %v365_v0, %v32_v61  ;;  %289 = vst [vmem:[%s886_s2 + $0x60] sm:$0xff] %v225_v7  ;;  %v165_v16 = vadd.f32 %v370_v1, %v97_v10  ;;  %v101_v17 = vmul.f32 %v365_v0, %v33_v4  ;;  %v46_v61 = vld [vmem:[%s884_s0 + $0x108] sm:$0xff] }
  0x11   :  { %290 = vst [vmem:[%s886_s2 + $0x68] sm:$0xff] %v226_v8  ;;  %291 = vst [vmem:[%s886_s2 + $0x70] sm:$0xff] %v227_v9  ;;  %v102_v18 = vmul.f32 %v365_v0, %v34_v5  ;;  %v103_v19 = vmul.f32 %v365_v0, %v35_v6  ;;  %v166_v20 = vadd.f32 %v370_v1, %v98_v13  ;;  %v49_v6 = vld [vmem:[%s884_s0 + $0x120] sm:$0xff]  ;;  %v50_v7 = vld [vmem:[%s884_s0 + $0x128] sm:$0xff] }
  0x12   :  { %292 = vst [vmem:[%s886_s2 + $0x78] sm:$0xff] %v228_v12  ;;  %v167_v21 = vadd.f32 %v370_v1, %v99_v14  ;;  %v168_v22 = vadd.f32 %v370_v1, %v100_v15  ;;  %v104_v23 = vmul.f32 %v365_v0, %v36_v11  ;;  %v229_v25 = vmax.f32 %v165_v16, 0.0  ;;  %v51_v8 = vld [vmem:[%s884_s0 + $0x130] sm:$0xff]  ;;  %v52_v13 = vld [vmem:[%s884_s0 + $0x138] sm:$0xff] }
  0x13   :  { %v169_v26 = vadd.f32 %v370_v1, %v101_v17  ;;  %v170_v27 = vadd.f32 %v370_v1, %v102_v18  ;;  %v171_v28 = vadd.f32 %v370_v1, %v103_v19  ;;  %v230_v32 = vmax.f32 %v166_v20, 0.0 }
  0x14   :  { %v231_v33 = vmax.f32 %v167_v21, 0.0  ;;  %v232_v34 = vmax.f32 %v168_v22, 0.0  ;;  %v172_v35 = vadd.f32 %v370_v1, %v104_v23  ;;  %293 = vst [vmem:[%s886_s2 + $0x80] sm:$0xff] %v229_v25  ;;  %v105_v42 = vmul.f32 %v365_v0, %v37_v24 }
  0x15   :  { %v233_v39 = vmax.f32 %v169_v26, 0.0  ;;  %v234_v40 = vmax.f32 %v170_v27, 0.0  ;;  %v235_v41 = vmax.f32 %v171_v28, 0.0  ;;  %294 = vst [vmem:[%s886_s2 + $0x88] sm:$0xff] %v230_v32  ;;  %v106_v45 = vmul.f32 %v365_v0, %v38_v29  ;;  %v53_v26 = vld [vmem:[%s884_s0 + $0x140] sm:$0xff]  ;;  %v55_v32 = vld [vmem:[%s884_s0 + $0x150] sm:$0xff] }
  0x16   :  { %295 = vst [vmem:[%s886_s2 + $0x90] sm:$0xff] %v231_v33  ;;  %296 = vst [vmem:[%s886_s2 + $0x98] sm:$0xff] %v232_v34  ;;  %v236_v44 = vmax.f32 %v172_v35, 0.0  ;;  %v107_v46 = vmul.f32 %v365_v0, %v39_v30  ;;  %v108_v47 = vmul.f32 %v365_v0, %v40_v31  ;;  %v173_v48 = vadd.f32 %v370_v1, %v105_v42  ;;  %v54_v31 = vld [vmem:[%s884_s0 + $0x148] sm:$0xff]  ;;  %v56_v33 = vld [vmem:[%s884_s0 + $0x158] sm:$0xff] }
  0x17   :  { %297 = vst [vmem:[%s886_s2 + $0xa0] sm:$0xff] %v233_v39  ;;  %298 = vst [vmem:[%s886_s2 + $0xa8] sm:$0xff] %v234_v40  ;;  %v109_v49 = vmul.f32 %v365_v0, %v41_v36  ;;  %v110_v50 = vmul.f32 %v365_v0, %v42_v37  ;;  %v111_v51 = vmul.f32 %v365_v0, %v43_v38  ;;  %v57_v38 = vld [vmem:[%s884_s0 + $0x160] sm:$0xff]  ;;  %v58_v39 = vld [vmem:[%s884_s0 + $0x168] sm:$0xff] }
  0x18   :  { %299 = vst [vmem:[%s886_s2 + $0xb0] sm:$0xff] %v235_v41  ;;  %300 = vst [vmem:[%s886_s2 + $0xb8] sm:$0xff] %v236_v44  ;;  %v174_v52 = vadd.f32 %v370_v1, %v106_v45  ;;  %v175_v53 = vadd.f32 %v370_v1, %v107_v46  ;;  %v176_v54 = vadd.f32 %v370_v1, %v108_v47  ;;  %v237_v57 = vmax.f32 %v173_v48, 0.0  ;;  %v59_v40 = vld [vmem:[%s884_s0 + $0x170] sm:$0xff]  ;;  %v60_v45 = vld [vmem:[%s884_s0 + $0x178] sm:$0xff] }
  0x19   :  { %v112_v55 = vmul.f32 %v365_v0, %v44_v43  ;;  %v177_v58 = vadd.f32 %v370_v1, %v109_v49  ;;  %v178_v59 = vadd.f32 %v370_v1, %v110_v50  ;;  %v179_v60 = vadd.f32 %v370_v1, %v111_v51 }
  0x1a   :  { %v238_v2 = vmax.f32 %v174_v52, 0.0  ;;  %v239_v3 = vmax.f32 %v175_v53, 0.0  ;;  %v240_v4 = vmax.f32 %v176_v54, 0.0  ;;  %301 = vst [vmem:[%s886_s2 + $0xc0] sm:$0xff] %v237_v57  ;;  %v113_v12 = vmul.f32 %v365_v0, %v45_v56 }
  0x1b   :  { %v180_v5 = vadd.f32 %v370_v1, %v112_v55  ;;  %v241_v9 = vmax.f32 %v177_v58, 0.0  ;;  %v242_v10 = vmax.f32 %v178_v59, 0.0  ;;  %v243_v11 = vmax.f32 %v179_v60, 0.0  ;;  %v61_v58 = vld [vmem:[%s884_s0 + $0x180] sm:$0xff] }
  0x1c   :  { %302 = vst [vmem:[%s886_s2 + $0xc8] sm:$0xff] %v238_v2  ;;  %303 = vst [vmem:[%s886_s2 + $0xd0] sm:$0xff] %v239_v3  ;;  %v114_v15 = vmul.f32 %v365_v0, %v46_v61  ;;  %v115_v16 = vmul.f32 %v365_v0, %v47_v62  ;;  %v116_v17 = vmul.f32 %v365_v0, %v48_v63  ;;  %v62_v63 = vld [vmem:[%s884_s0 + $0x188] sm:$0xff]  ;;  %v63_v2 = vld [vmem:[%s884_s0 + $0x190] sm:$0xff] }
  0x1d   :  { %304 = vst [vmem:[%s886_s2 + $0xd8] sm:$0xff] %v240_v4  ;;  %v244_v14 = vmax.f32 %v180_v5, 0.0  ;;  %305 = vst [vmem:[%s886_s2 + $0xe0] sm:$0xff] %v241_v9  ;;  %v181_v18 = vadd.f32 %v370_v1, %v113_v12  ;;  %v117_v19 = vmul.f32 %v365_v0, %v49_v6  ;;  %v118_v20 = vmul.f32 %v365_v0, %v50_v7  ;;  %v64_v3 = vld [vmem:[%s884_s0 + $0x198] sm:$0xff]  ;;  %v66_v9 = vld [vmem:[%s884_s0 + $0x1a8] sm:$0xff] }
  0x1e   :  { %306 = vst [vmem:[%s886_s2 + $0xe8] sm:$0xff] %v242_v10  ;;  %307 = vst [vmem:[%s886_s2 + $0xf0] sm:$0xff] %v243_v11  ;;  %v119_v21 = vmul.f32 %v365_v0, %v51_v8  ;;  %v182_v22 = vadd.f32 %v370_v1, %v114_v15  ;;  %v183_v23 = vadd.f32 %v370_v1, %v115_v16  ;;  %v65_v8 = vld [vmem:[%s884_s0 + $0x1a0] sm:$0xff]  ;;  %v67_v10 = vld [vmem:[%s884_s0 + $0x1b0] sm:$0xff] }
  0x1f   :  { %308 = vst [vmem:[%s886_s2 + $0xf8] sm:$0xff] %v244_v14  ;;  %v184_v24 = vadd.f32 %v370_v1, %v116_v17  ;;  %v120_v25 = vmul.f32 %v365_v0, %v52_v13  ;;  %v245_v27 = vmax.f32 %v181_v18, 0.0  ;;  %v185_v28 = vadd.f32 %v370_v1, %v117_v19  ;;  %v68_v15 = vld [vmem:[%s884_s0 + $0x1b8] sm:$0xff] }
  0x20   :  { %v186_v29 = vadd.f32 %v370_v1, %v118_v20  ;;  %v187_v30 = vadd.f32 %v370_v1, %v119_v21  ;;  %v246_v34 = vmax.f32 %v182_v22, 0.0  ;;  %v247_v35 = vmax.f32 %v183_v23, 0.0 }
  0x21   :  { %v248_v36 = vmax.f32 %v184_v24, 0.0  ;;  %v188_v37 = vadd.f32 %v370_v1, %v120_v25  ;;  %309 = vst [vmem:[%s886_s2 + $0x100] sm:$0xff] %v245_v27  ;;  %v249_v41 = vmax.f32 %v185_v28, 0.0  ;;  %v121_v44 = vmul.f32 %v365_v0, %v53_v26  ;;  %v69_v28 = vld [vmem:[%s884_s0 + $0x1c0] sm:$0xff] }
  0x22   :  { %v250_v42 = vmax.f32 %v186_v29, 0.0  ;;  %v251_v43 = vmax.f32 %v187_v30, 0.0  ;;  %310 = vst [vmem:[%s886_s2 + $0x108] sm:$0xff] %v246_v34  ;;  %311 = vst [vmem:[%s886_s2 + $0x110] sm:$0xff] %v247_v35  ;;  %v122_v47 = vmul.f32 %v365_v0, %v54_v31  ;;  %v123_v48 = vmul.f32 %v365_v0, %v55_v32  ;;  %v71_v34 = vld [vmem:[%s884_s0 + $0x1d0] sm:$0xff]  ;;  %v72_v35 = vld [vmem:[%s884_s0 + $0x1d8] sm:$0xff] }
  0x23   :  { %312 = vst [vmem:[%s886_s2 + $0x118] sm:$0xff] %v248_v36  ;;  %v252_v46 = vmax.f32 %v188_v37, 0.0  ;;  %v124_v49 = vmul.f32 %v365_v0, %v56_v33  ;;  %313 = vst [vmem:[%s886_s2 + $0x120] sm:$0xff] %v249_v41  ;;  %v189_v50 = vadd.f32 %v370_v1, %v121_v44  ;;  %v125_v51 = vmul.f32 %v365_v0, %v57_v38  ;;  %v70_v33 = vld [vmem:[%s884_s0 + $0x1c8] sm:$0xff] }
  0x24   :  { %314 = vst [vmem:[%s886_s2 + $0x128] sm:$0xff] %v250_v42  ;;  %315 = vst [vmem:[%s886_s2 + $0x130] sm:$0xff] %v251_v43  ;;  %v126_v52 = vmul.f32 %v365_v0, %v58_v39  ;;  %v127_v53 = vmul.f32 %v365_v0, %v59_v40  ;;  %v190_v54 = vadd.f32 %v370_v1, %v122_v47  ;;  %v73_v40 = vld [vmem:[%s884_s0 + $0x1e0] sm:$0xff]  ;;  %v74_v41 = vld [vmem:[%s884_s0 + $0x1e8] sm:$0xff] }
  0x25   :  { %316 = vst [vmem:[%s886_s2 + $0x138] sm:$0xff] %v252_v46  ;;  %v191_v55 = vadd.f32 %v370_v1, %v123_v48  ;;  %v192_v56 = vadd.f32 %v370_v1, %v124_v49  ;;  %v128_v57 = vmul.f32 %v365_v0, %v60_v45  ;;  %v253_v59 = vmax.f32 %v189_v50, 0.0  ;;  %v75_v42 = vld [vmem:[%s884_s0 + $0x1f0] sm:$0xff]  ;;  %v76_v47 = vld [vmem:[%s884_s0 + $0x1f8] sm:$0xff] }
  0x26   :  { %v193_v60 = vadd.f32 %v370_v1, %v125_v51  ;;  %v194_v61 = vadd.f32 %v370_v1, %v126_v52  ;;  %v195_v62 = vadd.f32 %v370_v1, %v127_v53  ;;  %v254_v4 = vmax.f32 %v190_v54, 0.0 }
  0x27   :  { %v255_v5 = vmax.f32 %v191_v55, 0.0  ;;  %v256_v6 = vmax.f32 %v192_v56, 0.0  ;;  %v196_v7 = vadd.f32 %v370_v1, %v128_v57  ;;  %317 = vst [vmem:[%s886_s2 + $0x140] sm:$0xff] %v253_v59  ;;  %v129_v14 = vmul.f32 %v365_v0, %v61_v58 }
  0x28   :  { %v257_v11 = vmax.f32 %v193_v60, 0.0  ;;  %v258_v12 = vmax.f32 %v194_v61, 0.0  ;;  %v259_v13 = vmax.f32 %v195_v62, 0.0  ;;  %318 = vst [vmem:[%s886_s2 + $0x148] sm:$0xff] %v254_v4  ;;  %v130_v17 = vmul.f32 %v365_v0, %v62_v63 }
  0x29   :  { %319 = vst [vmem:[%s886_s2 + $0x150] sm:$0xff] %v255_v5  ;;  %320 = vst [vmem:[%s886_s2 + $0x158] sm:$0xff] %v256_v6  ;;  %v260_v16 = vmax.f32 %v196_v7, 0.0  ;;  %v131_v18 = vmul.f32 %v365_v0, %v63_v2  ;;  %v132_v19 = vmul.f32 %v365_v0, %v64_v3  ;;  %v197_v20 = vadd.f32 %v370_v1, %v129_v14 }
  0x2a   :  { %321 = vst [vmem:[%s886_s2 + $0x160] sm:$0xff] %v257_v11  ;;  %322 = vst [vmem:[%s886_s2 + $0x168] sm:$0xff] %v258_v12  ;;  %v133_v21 = vmul.f32 %v365_v0, %v65_v8  ;;  %v134_v22 = vmul.f32 %v365_v0, %v66_v9  ;;  %v135_v23 = vmul.f32 %v365_v0, %v67_v10 }
  0x2b   :  { %323 = vst [vmem:[%s886_s2 + $0x170] sm:$0xff] %v259_v13  ;;  %324 = vst [vmem:[%s886_s2 + $0x178] sm:$0xff] %v260_v16  ;;  %v198_v24 = vadd.f32 %v370_v1, %v130_v17  ;;  %v199_v25 = vadd.f32 %v370_v1, %v131_v18  ;;  %v200_v26 = vadd.f32 %v370_v1, %v132_v19  ;;  %v261_v29 = vmax.f32 %v197_v20, 0.0 }
  0x2c   :  { %v136_v27 = vmul.f32 %v365_v0, %v68_v15  ;;  %v201_v30 = vadd.f32 %v370_v1, %v133_v21  ;;  %v202_v31 = vadd.f32 %v370_v1, %v134_v22  ;;  %v203_v32 = vadd.f32 %v370_v1, %v135_v23 }
  0x2d   :  { %v262_v36 = vmax.f32 %v198_v24, 0.0  ;;  %v263_v37 = vmax.f32 %v199_v25, 0.0  ;;  %v264_v38 = vmax.f32 %v200_v26, 0.0  ;;  %325 = vst [vmem:[%s886_s2 + $0x180] sm:$0xff] %v261_v29  ;;  %v137_v46 = vmul.f32 %v365_v0, %v69_v28 }
  0x2e   :  { %v204_v39 = vadd.f32 %v370_v1, %v136_v27  ;;  %v265_v43 = vmax.f32 %v201_v30, 0.0  ;;  %v266_v44 = vmax.f32 %v202_v31, 0.0  ;;  %v267_v45 = vmax.f32 %v203_v32, 0.0 }
  0x2f   :  { %326 = vst [vmem:[%s886_s2 + $0x188] sm:$0xff] %v262_v36  ;;  %327 = vst [vmem:[%s886_s2 + $0x190] sm:$0xff] %v263_v37  ;;  %v138_v49 = vmul.f32 %v365_v0, %v70_v33  ;;  %v139_v50 = vmul.f32 %v365_v0, %v71_v34  ;;  %v140_v51 = vmul.f32 %v365_v0, %v72_v35 }
  0x30   :  { %328 = vst [vmem:[%s886_s2 + $0x198] sm:$0xff] %v264_v38  ;;  %v268_v48 = vmax.f32 %v204_v39, 0.0  ;;  %329 = vst [vmem:[%s886_s2 + $0x1a0] sm:$0xff] %v265_v43  ;;  %v205_v52 = vadd.f32 %v370_v1, %v137_v46  ;;  %v141_v53 = vmul.f32 %v365_v0, %v73_v40  ;;  %v142_v54 = vmul.f32 %v365_v0, %v74_v41 }
  0x31   :  { %330 = vst [vmem:[%s886_s2 + $0x1a8] sm:$0xff] %v266_v44  ;;  %331 = vst [vmem:[%s886_s2 + $0x1b0] sm:$0xff] %v267_v45  ;;  %v143_v55 = vmul.f32 %v365_v0, %v75_v42  ;;  %v206_v56 = vadd.f32 %v370_v1, %v138_v49  ;;  %v207_v57 = vadd.f32 %v370_v1, %v139_v50 }
  0x32   :  { %332 = vst [vmem:[%s886_s2 + $0x1b8] sm:$0xff] %v268_v48  ;;  %v208_v58 = vadd.f32 %v370_v1, %v140_v51  ;;  %v144_v59 = vmul.f32 %v365_v0, %v76_v47  ;;  %v269_v60 = vmax.f32 %v205_v52, 0.0  ;;  %v209_v61 = vadd.f32 %v370_v1, %v141_v53 }
  0x33   :  { %v210_v62 = vadd.f32 %v370_v1, %v142_v54  ;;  %v211_v63 = vadd.f32 %v370_v1, %v143_v55  ;;  %v270_v2 = vmax.f32 %v206_v56, 0.0  ;;  %v271_v3 = vmax.f32 %v207_v57, 0.0 }
  0x34   :  { %v272_v4 = vmax.f32 %v208_v58, 0.0  ;;  %v212_v5 = vadd.f32 %v370_v1, %v144_v59  ;;  %333 = vst [vmem:[%s886_s2 + $0x1c0] sm:$0xff] %v269_v60  ;;  %v273_v6 = vmax.f32 %v209_v61, 0.0 }
  0x35   :  { %v274_v7 = vmax.f32 %v210_v62, 0.0  ;;  %v275_v8 = vmax.f32 %v211_v63, 0.0  ;;  %334 = vst [vmem:[%s886_s2 + $0x1c8] sm:$0xff] %v270_v2  ;;  %335 = vst [vmem:[%s886_s2 + $0x1d0] sm:$0xff] %v271_v3 }
  0x36   :  { %336 = vst [vmem:[%s886_s2 + $0x1d8] sm:$0xff] %v272_v4  ;;  %v276_v0 = vmax.f32 %v212_v5, 0.0  ;;  %337 = vst [vmem:[%s886_s2 + $0x1e0] sm:$0xff] %v273_v6 }
  0x37   :  { %338 = vst [vmem:[%s886_s2 + $0x1e8] sm:$0xff] %v274_v7  ;;  %339 = vst [vmem:[%s886_s2 + $0x1f0] sm:$0xff] %v275_v8 }
  0x38   :  { %340 = vst [vmem:[%s886_s2 + $0x1f8] sm:$0xff] %v276_v0 }

// kernel: conv_block_forward.2
= control target key start
LH: loop header
LB: loop body
LE: loop exit
PB: predicated region body
PF: predicated region fallthrough
CT: control target
= control target key end

     0   :  { %vm94_vm0 = vcmask 326656   ;;  %s1924_s1 = inlined_call_operand.vmem [shape: f32[40,128], index: 1, kind: input, shape index: {}]   ;;  %s1925_s0 = inlined_call_operand.vmem [shape: f32[512,40], index: 0, kind: input, shape index: {}]   ;;  %s1926_s4 = inlined_call_operand.vmem [shape: f32[512,128], index: 4, kind: output, shape index: {0}]   ;;  %s1927_s2 = inlined_call_operand.vmem [shape: f32[1,128], index: 2, kind: input, shape index: {}]   ;;  %s1928_s3 = inlined_call_operand.vmem [shape: f32[1,128], index: 3, kind: input, shape index: {}]   ;;  %s1929_s5 = inlined_call_operand.vmem [shape: f32[2,128], index: 5, kind: output, shape index: {1}]  }
   0x1   :  { %v89_v0 = vld [vmem:[%s1924_s1] sm:$0xff]  ;;  %v90_v1 = vld [vmem:[%s1924_s1 + $0x8] sm:$0xff]  ;;  %v91_v2 = vld [vmem:[%s1924_s1 + $0x10] sm:$0xff] }
   0x2   :  { %v1209_v3 = vpack.c.bf16 %v90_v1, %v89_v0  ;;  %v92_v4 = vld [vmem:[%s1924_s1 + $0x18] sm:$0xff]  ;;  %v25_v5 = vld [vmem:[%s1925_s0] sm:$0xff]  ;;  %v26_v8 = vld [vmem:[%s1925_s0 + $0x8] sm:$0xff] }
   0x3   :  { %v1213_v6 = vpack.c.bf16 %v92_v4, %v91_v2  ;;  %1113 = vmatprep.mubr.msk.f32.mxu0 %vm94_vm0, %v25_v5  ;;  %v93_v7 = vld [vmem:[%s1924_s1 + $0x20] sm:$0xff]  ;;  %v27_v9 = vld [vmem:[%s1925_s0 + $0x10] sm:$0xff]  ;;  %v58_v11 = vld [vmem:[%s1925_s0 + $0x108] sm:$0xff] }
   0x4   :  { %1210 = vmatprep.subr.bf16.mxu0 %v1209_v3  ;;  %1217 = vmatprep.subr.bf16.mxu1 %v1209_v3  ;;  %v57_v10 = vld [vmem:[%s1925_s0 + $0x100] sm:$0xff]  ;;  %v59_v12 = vld [vmem:[%s1925_s0 + $0x110] sm:$0xff]  ;;  %v28_v13 = vld [vmem:[%s1925_s0 + $0x18] sm:$0xff] }
   0x5   :  { %1212 = vmatpush3.bf16.msra.mxu0 %v1209_v3  ;;  %1220 = vmatpush3.bf16.msra.mxu1 %v1209_v3  ;;  %v29_v14 = vld [vmem:[%s1925_s0 + $0x20] sm:$0xff]  ;;  %v60_v15 = vld [vmem:[%s1925_s0 + $0x118] sm:$0xff]  ;;  %v30_v17 = vld [vmem:[%s1925_s0 + $0x28] sm:$0xff] }
   0x6   :  { %1214 = vmatprep.subr.bf16.mxu0 %v1213_v6  ;;  %1218 = vmatprep.subr.bf16.mxu1 %v1213_v6  ;;  %v61_v16 = vld [vmem:[%s1925_s0 + $0x120] sm:$0xff]  ;;  %v31_v18 = vld [vmem:[%s1925_s0 + $0x30] sm:$0xff]  ;;  %v62_v19 = vld [vmem:[%s1925_s0 + $0x128] sm:$0xff] }
   0x7   :  { %1161 = vmatprep.mubr.msk.f32.mxu1 %vm94_vm0, %v57_v10  ;;  %v63_v20 = vld [vmem:[%s1925_s0 + $0x130] sm:$0xff]  ;;  %v32_v21 = vld [vmem:[%s1925_s0 + $0x38] sm:$0xff]  ;;  %v33_v22 = vld [vmem:[%s1925_s0 + $0x40] sm:$0xff] }
   0x8   :  { %v64_v23 = vld [vmem:[%s1925_s0 + $0x138] sm:$0xff]  ;;  %v65_v24 = vld [vmem:[%s1925_s0 + $0x140] sm:$0xff]  ;;  %v34_v25 = vld [vmem:[%s1925_s0 + $0x48] sm:$0xff] }
   0x9   :  { %1216 = vmatpush3.bf16.msra.mxu0 %v1213_v6  ;;  %1221 = vmatpush3.bf16.msra.mxu1 %v1213_v6  ;;  %v35_v26 = vld [vmem:[%s1925_s0 + $0x50] sm:$0xff]  ;;  %v66_v27 = vld [vmem:[%s1925_s0 + $0x148] sm:$0xff]  ;;  %v36_v29 = vld [vmem:[%s1925_s0 + $0x58] sm:$0xff] }
   0xa   :  { %1111 = vmatprep.subr.mxu0 %v93_v7  ;;  %1219 = vmatprep.subr.mxu1 %v93_v7  ;;  %v67_v28 = vld [vmem:[%s1925_s0 + $0x150] sm:$0xff]  ;;  %v37_v30 = vld [vmem:[%s1925_s0 + $0x60] sm:$0xff]  ;;  %v68_v31 = vld [vmem:[%s1925_s0 + $0x158] sm:$0xff] }
   0xb   :  { %v69_v32 = vld [vmem:[%s1925_s0 + $0x160] sm:$0xff]  ;;  %v38_v33 = vld [vmem:[%s1925_s0 + $0x68] sm:$0xff]  ;;  %v39_v34 = vld [vmem:[%s1925_s0 + $0x70] sm:$0xff] }
   0xc   :  { %v70_v35 = vld [vmem:[%s1925_s0 + $0x168] sm:$0xff]  ;;  %v71_v36 = vld [vmem:[%s1925_s0 + $0x170] sm:$0xff]  ;;  %v40_v37 = vld [vmem:[%s1925_s0 + $0x78] sm:$0xff] }
   0xd   :  { %1112 = vmatpush3.msra.mxu0 %v93_v7  ;;  %1222 = vmatpush3.msra.mxu1 %v93_v7  ;;  %v41_v38 = vld [vmem:[%s1925_s0 + $0x80] sm:$0xff]  ;;  %v72_v39 = vld [vmem:[%s1925_s0 + $0x178] sm:$0xff]  ;;  %v42_v41 = vld [vmem:[%s1925_s0 + $0x88] sm:$0xff]  ;;  %v1226_v7 = vmov 0.0  }
   0xe   :  { %1114 = vmatmul.mubr.msk.f32.vlgmr.msra.gmra.mrb[0].mxu0 %vm94_vm0, %v26_v8  ;;  %1162 = vmatmul.mubr.msk.f32.vlgmr.msra.gmra.mrb[0].mxu1 %vm94_vm0, %v58_v11  ;;  %v73_v40 = vld [vmem:[%s1925_s0 + $0x180] sm:$0xff]  ;;  %v43_v42 = vld [vmem:[%s1925_s0 + $0x90] sm:$0xff]  ;;  %v74_v43 = vld [vmem:[%s1925_s0 + $0x188] sm:$0xff]  ;;  %23 = vst [vmem:[#allocation2] sm:$0x1] %v1226_v7 }
   0xf   :  { %1116 = vmatprep.mubr.msk.f32.mxu0 %vm94_vm0, %v27_v9  ;;  %1164 = vmatprep.mubr.msk.f32.mxu1 %vm94_vm0, %v59_v12  ;;  %v75_v44 = vld [vmem:[%s1925_s0 + $0x190] sm:$0xff]  ;;  %v44_v45 = vld [vmem:[%s1925_s0 + $0x98] sm:$0xff]  ;;  %v45_v46 = vld [vmem:[%s1925_s0 + $0xa0] sm:$0xff]  ;;  %24 = vst [vmem:[#allocation3] sm:$0x1] %v1226_v7 }
  0x10   :  { %v76_v47 = vld [vmem:[%s1925_s0 + $0x198] sm:$0xff]  ;;  %v77_v48 = vld [vmem:[%s1925_s0 + $0x1a0] sm:$0xff]  ;;  %v46_v49 = vld [vmem:[%s1925_s0 + $0xa8] sm:$0xff] }
  0x11   :  { %v47_v50 = vld [vmem:[%s1925_s0 + $0xb0] sm:$0xff]  ;;  %v78_v51 = vld [vmem:[%s1925_s0 + $0x1a8] sm:$0xff]  ;;  %v48_v53 = vld [vmem:[%s1925_s0 + $0xb8] sm:$0xff] }
  0x12   :  { %1117 = vmatmul.mubr.msk.f32.gmra.mrb[2].mxu0 %vm94_vm0, %v28_v13  ;;  %1165 = vmatmul.mubr.msk.f32.gmra.mrb[2].mxu1 %vm94_vm0, %v60_v15  ;;  %v79_v52 = vld [vmem:[%s1925_s0 + $0x1b0] sm:$0xff]  ;;  %v49_v54 = vld [vmem:[%s1925_s0 + $0xc0] sm:$0xff]  ;;  %v80_v55 = vld [vmem:[%s1925_s0 + $0x1b8] sm:$0xff] }
  0x13   :  { %1119 = vmatprep.mubr.msk.f32.mxu0 %vm94_vm0, %v29_v14  ;;  %1167 = vmatprep.mubr.msk.f32.mxu1 %vm94_vm0, %v61_v16  ;;  %v81_v56 = vld [vmem:[%s1925_s0 + $0x1c0] sm:$0xff]  ;;  %v50_v57 = vld [vmem:[%s1925_s0 + $0xc8] sm:$0xff]  ;;  %v51_v58 = vld [vmem:[%s1925_s0 + $0xd0] sm:$0xff] }
  0x14   :  { %v82_v59 = vld [vmem:[%s1925_s0 + $0x1c8] sm:$0xff]  ;;  %v83_v60 = vld [vmem:[%s1925_s0 + $0x1d0] sm:$0xff]  ;;  %v52_v61 = vld [vmem:[%s1925_s0 + $0xd8] sm:$0xff] }
  0x15   :  { %v53_v62 = vld [vmem:[%s1925_s0 + $0xe0] sm:$0xff]  ;;  %v84_v63 = vld [vmem:[%s1925_s0 + $0x1d8] sm:$0xff]  ;;  %v54_v1 = vld [vmem:[%s1925_s0 + $0xe8] sm:$0xff] }
  0x16   :  { %1120 = vmatmul.mubr.msk.f32.gmra.mrb[4].mxu0 %vm94_vm0, %v30_v17  ;;  %1168 = vmatmul.mubr.msk.f32.gmra.mrb[4].mxu1 %vm94_vm0, %v62_v19  ;;  %v85_v0 = vld [vmem:[%s1925_s0 + $0x1e0] sm:$0xff]  ;;  %v55_v2 = vld [vmem:[%s1925_s0 + $0xf0] sm:$0xff]  ;;  %v86_v3 = vld [vmem:[%s1925_s0 + $0x1e8] sm:$0xff] }
  0x17   :  { %1122 = vmatprep.mubr.msk.f32.mxu0 %vm94_vm0, %v31_v18  ;;  %1170 = vmatprep.mubr.msk.f32.mxu1 %vm94_vm0, %v63_v20  ;;  %v87_v4 = vld [vmem:[%s1925_s0 + $0x1f0] sm:$0xff]  ;;  %v56_v5 = vld [vmem:[%s1925_s0 + $0xf8] sm:$0xff] }
  0x18   :  { %v88_v6 = vld [vmem:[%s1925_s0 + $0x1f8] sm:$0xff] }
  0x1a   :  { %1123 = vmatmul.mubr.msk.f32.gmra.mrb[6].mxu0 %vm94_vm0, %v32_v21  ;;  %1171 = vmatmul.mubr.msk.f32.gmra.mrb[6].mxu1 %vm94_vm0, %v64_v23 }
  0x1b   :  { %1125 = vmatprep.mubr.msk.f32.mxu0 %vm94_vm0, %v33_v22  ;;  %1173 = vmatprep.mubr.msk.f32.mxu1 %vm94_vm0, %v65_v24 }
  0x1e   :  { %1126 = vmatmul.mubr.msk.f32.gmra.mrb[8].mxu0 %vm94_vm0, %v34_v25  ;;  %1174 = vmatmul.mubr.msk.f32.gmra.mrb[8].mxu1 %vm94_vm0, %v66_v27 }
  0x1f   :  { %1128 = vmatprep.mubr.msk.f32.mxu0 %vm94_vm0, %v35_v26  ;;  %1176 = vmatprep.mubr.msk.f32.mxu1 %vm94_vm0, %v67_v28 }
  0x22   :  { %1129 = vmatmul.mubr.msk.f32.gmra.mrb[10].mxu0 %vm94_vm0, %v36_v29  ;;  %1177 = vmatmul.mubr.msk.f32.gmra.mrb[10].mxu1 %vm94_vm0, %v68_v31 }
  0x23   :  { %1131 = vmatprep.mubr.msk.f32.mxu0 %vm94_vm0, %v37_v30  ;;  %1179 = vmatprep.mubr.msk.f32.mxu1 %vm94_vm0, %v69_v32 }
  0x26   :  { %1132 = vmatmul.mubr.msk.f32.gmra.mrb[12].mxu0 %vm94_vm0, %v38_v33  ;;  %1180 = vmatmul.mubr.msk.f32.gmra.mrb[12].mxu1 %vm94_vm0, %v70_v35 }
  0x27   :  { %1134 = vmatprep.mubr.msk.f32.mxu0 %vm94_vm0, %v39_v34  ;;  %1182 = vmatprep.mubr.msk.f32.mxu1 %vm94_vm0, %v71_v36 }
  0x2a   :  { %1135 = vmatmul.mubr.msk.f32.gmra.mrb[14].mxu0 %vm94_vm0, %v40_v37  ;;  %1183 = vmatmul.mubr.msk.f32.gmra.mrb[14].mxu1 %vm94_vm0, %v72_v39 }
  0x2b   :  { %1137 = vmatprep.mubr.msk.f32.mxu0 %vm94_vm0, %v41_v38  ;;  %1185 = vmatprep.mubr.msk.f32.mxu1 %vm94_vm0, %v73_v40 }
  0x2e   :  { %1138 = vmatmul.mubr.msk.f32.gmra.mrb[16].mxu0 %vm94_vm0, %v42_v41  ;;  %1186 = vmatmul.mubr.msk.f32.gmra.mrb[16].mxu1 %vm94_vm0, %v74_v43 }
  0x2f   :  { %1140 = vmatprep.mubr.msk.f32.mxu0 %vm94_vm0, %v43_v42  ;;  %1188 = vmatprep.mubr.msk.f32.mxu1 %vm94_vm0, %v75_v44 }
  0x32   :  { %1141 = vmatmul.mubr.msk.f32.gmra.mrb[18].mxu0 %vm94_vm0, %v44_v45  ;;  %1189 = vmatmul.mubr.msk.f32.gmra.mrb[18].mxu1 %vm94_vm0, %v76_v47 }
  0x33   :  { %1143 = vmatprep.mubr.msk.f32.mxu0 %vm94_vm0, %v45_v46  ;;  %1191 = vmatprep.mubr.msk.f32.mxu1 %vm94_vm0, %v77_v48 }
  0x36   :  { %1144 = vmatmul.mubr.msk.f32.gmra.mrb[20].mxu0 %vm94_vm0, %v46_v49  ;;  %1192 = vmatmul.mubr.msk.f32.gmra.mrb[20].mxu1 %vm94_vm0, %v78_v51 }
  0x37   :  { %1146 = vmatprep.mubr.msk.f32.mxu0 %vm94_vm0, %v47_v50  ;;  %1194 = vmatprep.mubr.msk.f32.mxu1 %vm94_vm0, %v79_v52 }
  0x3a   :  { %1147 = vmatmul.mubr.msk.f32.gmra.mrb[22].mxu0 %vm94_vm0, %v48_v53  ;;  %1195 = vmatmul.mubr.msk.f32.gmra.mrb[22].mxu1 %vm94_vm0, %v80_v55 }
  0x3b   :  { %1149 = vmatprep.mubr.msk.f32.mxu0 %vm94_vm0, %v49_v54  ;;  %1197 = vmatprep.mubr.msk.f32.mxu1 %vm94_vm0, %v81_v56 }
  0x3e   :  { %1150 = vmatmul.mubr.msk.f32.gmra.mrb[24].mxu0 %vm94_vm0, %v50_v57  ;;  %1198 = vmatmul.mubr.msk.f32.gmra.mrb[24].mxu1 %vm94_vm0, %v82_v59 }
  0x3f   :  { %1152 = vmatprep.mubr.msk.f32.mxu0 %vm94_vm0, %v51_v58  ;;  %1200 = vmatprep.mubr.msk.f32.mxu1 %vm94_vm0, %v83_v60 }
  0x42   :  { %1153 = vmatmul.mubr.msk.f32.gmra.mrb[26].mxu0 %vm94_vm0, %v52_v61  ;;  %1201 = vmatmul.mubr.msk.f32.gmra.mrb[26].mxu1 %vm94_vm0, %v84_v63 }
  0x43   :  { %1155 = vmatprep.mubr.msk.f32.mxu0 %vm94_vm0, %v53_v62  ;;  %1203 = vmatprep.mubr.msk.f32.mxu1 %vm94_vm0, %v85_v0 }
  0x46   :  { %1156 = vmatmul.mubr.msk.f32.gmra.mrb[28].mxu0 %vm94_vm0, %v54_v1  ;;  %1204 = vmatmul.mubr.msk.f32.gmra.mrb[28].mxu1 %vm94_vm0, %v86_v3 }
  0x47   :  { %1158 = vmatprep.mubr.msk.f32.mxu0 %vm94_vm0, %v55_v2  ;;  %1206 = vmatprep.mubr.msk.f32.mxu1 %vm94_vm0, %v87_v4 }
  0x4a   :  { %1159 = vmatmul.mubr.msk.f32.gmra.mrb[30].mxu0 %vm94_vm0, %v56_v5  ;;  %1207 = vmatmul.mubr.msk.f32.gmra.mrb[30].mxu1 %vm94_vm0, %v88_v6 }
  0xe1   :  { %v1115_v8 = vpop.f32.mrb[0].mxu0  ;;  %v1531_v11 = vpop.f32.mrb[0].mxu1 }
  0xe2   :  { %673 = vst [vmem:[%s1926_s4 + $0x8] sm:$0xff] %v1115_v8  ;;  %v810_v9 = vmul.f32 %v1115_v8, %v1115_v8  ;;  %v353_v10 = vpop.f32.mrb[1].mxu0  ;;  %705 = vst [vmem:[%s1926_s4 + $0x108] sm:$0xff] %v1531_v11  ;;  %v1540_v14 = vpop.f32.mrb[1].mxu1 }
  0xe3   :  { %672 = vst [vmem:[%s1926_s4] sm:$0xff] %v353_v10  ;;  %v737_v12 = vadd.f32 %v1115_v8, %v353_v10  ;;  %v809_v13 = vmul.f32 %v353_v10, %v353_v10  ;;  %704 = vst [vmem:[%s1926_s4 + $0x100] sm:$0xff] %v1540_v14 }
  0xe5   :  { %v873_v15 = vadd.f32 %v810_v9, %v809_v13  ;;  %v1118_v16 = vpop.f32.mrb[2].mxu0  ;;  %v1549_v18 = vpop.f32.mrb[2].mxu1 }
  0xe6   :  { %675 = vst [vmem:[%s1926_s4 + $0x18] sm:$0xff] %v1118_v16  ;;  %v363_v17 = vpop.f32.mrb[3].mxu0  ;;  %707 = vst [vmem:[%s1926_s4 + $0x118] sm:$0xff] %v1549_v18  ;;  %v1558_v21 = vpop.f32.mrb[3].mxu1  ;;  %v812_v22 = vmul.f32 %v1118_v16, %v1118_v16 }
  0xe7   :  { %674 = vst [vmem:[%s1926_s4 + $0x10] sm:$0xff] %v363_v17  ;;  %v738_v19 = vadd.f32 %v737_v12, %v363_v17  ;;  %v811_v20 = vmul.f32 %v363_v17, %v363_v17  ;;  %706 = vst [vmem:[%s1926_s4 + $0x110] sm:$0xff] %v1558_v21 }
  0xe9   :  { %v874_v23 = vadd.f32 %v873_v15, %v811_v20  ;;  %v1121_v24 = vpop.f32.mrb[4].mxu0  ;;  %v739_v25 = vadd.f32 %v1118_v16, %v738_v19  ;;  %v1567_v27 = vpop.f32.mrb[4].mxu1 }
  0xea   :  { %677 = vst [vmem:[%s1926_s4 + $0x28] sm:$0xff] %v1121_v24  ;;  %v373_v26 = vpop.f32.mrb[5].mxu0  ;;  %709 = vst [vmem:[%s1926_s4 + $0x128] sm:$0xff] %v1567_v27  ;;  %v1576_v31 = vpop.f32.mrb[5].mxu1  ;;  %v814_v32 = vmul.f32 %v1121_v24, %v1121_v24 }
  0xeb   :  { %676 = vst [vmem:[%s1926_s4 + $0x20] sm:$0xff] %v373_v26  ;;  %v740_v28 = vadd.f32 %v739_v25, %v373_v26  ;;  %v813_v29 = vmul.f32 %v373_v26, %v373_v26  ;;  %v875_v30 = vadd.f32 %v874_v23, %v812_v22  ;;  %708 = vst [vmem:[%s1926_s4 + $0x120] sm:$0xff] %v1576_v31 }
  0xed   :  { %v876_v33 = vadd.f32 %v875_v30, %v813_v29  ;;  %v1124_v34 = vpop.f32.mrb[6].mxu0  ;;  %v741_v35 = vadd.f32 %v1121_v24, %v740_v28  ;;  %v1585_v37 = vpop.f32.mrb[6].mxu1 }
  0xee   :  { %679 = vst [vmem:[%s1926_s4 + $0x38] sm:$0xff] %v1124_v34  ;;  %v383_v36 = vpop.f32.mrb[7].mxu0  ;;  %711 = vst [vmem:[%s1926_s4 + $0x138] sm:$0xff] %v1585_v37  ;;  %v1594_v41 = vpop.f32.mrb[7].mxu1  ;;  %v816_v42 = vmul.f32 %v1124_v34, %v1124_v34 }
  0xef   :  { %678 = vst [vmem:[%s1926_s4 + $0x30] sm:$0xff] %v383_v36  ;;  %v742_v38 = vadd.f32 %v741_v35, %v383_v36  ;;  %v815_v39 = vmul.f32 %v383_v36, %v383_v36  ;;  %v877_v40 = vadd.f32 %v876_v33, %v814_v32  ;;  %710 = vst [vmem:[%s1926_s4 + $0x130] sm:$0xff] %v1594_v41 }
  0xf1   :  { %v878_v43 = vadd.f32 %v877_v40, %v815_v39  ;;  %v1127_v44 = vpop.f32.mrb[8].mxu0  ;;  %v743_v45 = vadd.f32 %v1124_v34, %v742_v38  ;;  %v1603_v47 = vpop.f32.mrb[8].mxu1 }
  0xf2   :  { %681 = vst [vmem:[%s1926_s4 + $0x48] sm:$0xff] %v1127_v44  ;;  %v393_v46 = vpop.f32.mrb[9].mxu0  ;;  %713 = vst [vmem:[%s1926_s4 + $0x148] sm:$0xff] %v1603_v47  ;;  %v1612_v51 = vpop.f32.mrb[9].mxu1  ;;  %v818_v52 = vmul.f32 %v1127_v44, %v1127_v44 }
  0xf3   :  { %680 = vst [vmem:[%s1926_s4 + $0x40] sm:$0xff] %v393_v46  ;;  %v744_v48 = vadd.f32 %v743_v45, %v393_v46  ;;  %v817_v49 = vmul.f32 %v393_v46, %v393_v46  ;;  %v879_v50 = vadd.f32 %v878_v43, %v816_v42  ;;  %712 = vst [vmem:[%s1926_s4 + $0x140] sm:$0xff] %v1612_v51 }
  0xf5   :  { %v880_v53 = vadd.f32 %v879_v50, %v817_v49  ;;  %v1130_v54 = vpop.f32.mrb[10].mxu0  ;;  %v745_v55 = vadd.f32 %v1127_v44, %v744_v48  ;;  %v1621_v57 = vpop.f32.mrb[10].mxu1 }
  0xf6   :  { %683 = vst [vmem:[%s1926_s4 + $0x58] sm:$0xff] %v1130_v54  ;;  %v403_v56 = vpop.f32.mrb[11].mxu0  ;;  %715 = vst [vmem:[%s1926_s4 + $0x158] sm:$0xff] %v1621_v57  ;;  %v1630_v61 = vpop.f32.mrb[11].mxu1  ;;  %v820_v62 = vmul.f32 %v1130_v54, %v1130_v54 }
  0xf7   :  { %682 = vst [vmem:[%s1926_s4 + $0x50] sm:$0xff] %v403_v56  ;;  %v746_v58 = vadd.f32 %v745_v55, %v403_v56  ;;  %v819_v59 = vmul.f32 %v403_v56, %v403_v56  ;;  %v881_v60 = vadd.f32 %v880_v53, %v818_v52  ;;  %714 = vst [vmem:[%s1926_s4 + $0x150] sm:$0xff] %v1630_v61 }
  0xf9   :  { %v882_v63 = vadd.f32 %v881_v60, %v819_v59  ;;  %v1133_v0 = vpop.f32.mrb[12].mxu0  ;;  %v747_v1 = vadd.f32 %v1130_v54, %v746_v58  ;;  %v1639_v3 = vpop.f32.mrb[12].mxu1 }
  0xfa   :  { %685 = vst [vmem:[%s1926_s4 + $0x68] sm:$0xff] %v1133_v0  ;;  %v413_v2 = vpop.f32.mrb[13].mxu0  ;;  %717 = vst [vmem:[%s1926_s4 + $0x168] sm:$0xff] %v1639_v3  ;;  %v1648_v7 = vpop.f32.mrb[13].mxu1  ;;  %v822_v8 = vmul.f32 %v1133_v0, %v1133_v0 }
  0xfb   :  { %684 = vst [vmem:[%s1926_s4 + $0x60] sm:$0xff] %v413_v2  ;;  %v748_v4 = vadd.f32 %v747_v1, %v413_v2  ;;  %v821_v5 = vmul.f32 %v413_v2, %v413_v2  ;;  %v883_v6 = vadd.f32 %v882_v63, %v820_v62  ;;  %716 = vst [vmem:[%s1926_s4 + $0x160] sm:$0xff] %v1648_v7 }
  0xfd   :  { %v884_v9 = vadd.f32 %v883_v6, %v821_v5  ;;  %v1136_v10 = vpop.f32.mrb[14].mxu0  ;;  %v749_v12 = vadd.f32 %v1133_v0, %v748_v4  ;;  %v1657_v15 = vpop.f32.mrb[14].mxu1 }
  0xfe   :  { %687 = vst [vmem:[%s1926_s4 + $0x78] sm:$0xff] %v1136_v10  ;;  %v423_v13 = vpop.f32.mrb[15].mxu0  ;;  %719 = vst [vmem:[%s1926_s4 + $0x178] sm:$0xff] %v1657_v15  ;;  %v1666_v20 = vpop.f32.mrb[15].mxu1  ;;  %v824_v22 = vmul.f32 %v1136_v10, %v1136_v10 }
  0xff   :  { %686 = vst [vmem:[%s1926_s4 + $0x70] sm:$0xff] %v423_v13  ;;  %v750_v16 = vadd.f32 %v749_v12, %v423_v13  ;;  %v823_v17 = vmul.f32 %v423_v13, %v423_v13  ;;  %v885_v19 = vadd.f32 %v884_v9, %v822_v8  ;;  %718 = vst [vmem:[%s1926_s4 + $0x170] sm:$0xff] %v1666_v20 }
 0x101   :  { %v886_v23 = vadd.f32 %v885_v19, %v823_v17  ;;  %v1139_v24 = vpop.f32.mrb[16].mxu0  ;;  %v751_v25 = vadd.f32 %v1136_v10, %v750_v16  ;;  %v1675_v28 = vpop.f32.mrb[16].mxu1 }
 0x102   :  { %689 = vst [vmem:[%s1926_s4 + $0x88] sm:$0xff] %v1139_v24  ;;  %v433_v26 = vpop.f32.mrb[17].mxu0  ;;  %721 = vst [vmem:[%s1926_s4 + $0x188] sm:$0xff] %v1675_v28  ;;  %v1684_v33 = vpop.f32.mrb[17].mxu1  ;;  %v826_v34 = vmul.f32 %v1139_v24, %v1139_v24 }
 0x103   :  { %688 = vst [vmem:[%s1926_s4 + $0x80] sm:$0xff] %v433_v26  ;;  %v752_v29 = vadd.f32 %v751_v25, %v433_v26  ;;  %v825_v30 = vmul.f32 %v433_v26, %v433_v26  ;;  %v887_v32 = vadd.f32 %v886_v23, %v824_v22  ;;  %720 = vst [vmem:[%s1926_s4 + $0x180] sm:$0xff] %v1684_v33 }
 0x105   :  { %v888_v35 = vadd.f32 %v887_v32, %v825_v30  ;;  %v1142_v36 = vpop.f32.mrb[18].mxu0  ;;  %v753_v38 = vadd.f32 %v1139_v24, %v752_v29  ;;  %v1693_v40 = vpop.f32.mrb[18].mxu1 }
 0x106   :  { %691 = vst [vmem:[%s1926_s4 + $0x98] sm:$0xff] %v1142_v36  ;;  %v443_v39 = vpop.f32.mrb[19].mxu0  ;;  %723 = vst [vmem:[%s1926_s4 + $0x198] sm:$0xff] %v1693_v40  ;;  %v1702_v45 = vpop.f32.mrb[19].mxu1  ;;  %v828_v46 = vmul.f32 %v1142_v36, %v1142_v36 }
 0x107   :  { %690 = vst [vmem:[%s1926_s4 + $0x90] sm:$0xff] %v443_v39  ;;  %v754_v42 = vadd.f32 %v753_v38, %v443_v39  ;;  %v827_v43 = vmul.f32 %v443_v39, %v443_v39  ;;  %v889_v44 = vadd.f32 %v888_v35, %v826_v34  ;;  %722 = vst [vmem:[%s1926_s4 + $0x190] sm:$0xff] %v1702_v45 }
 0x109   :  { %v890_v48 = vadd.f32 %v889_v44, %v827_v43  ;;  %v1145_v49 = vpop.f32.mrb[20].mxu0  ;;  %v755_v50 = vadd.f32 %v1142_v36, %v754_v42  ;;  %v1711_v53 = vpop.f32.mrb[20].mxu1 }
 0x10a   :  { %693 = vst [vmem:[%s1926_s4 + $0xa8] sm:$0xff] %v1145_v49  ;;  %v453_v52 = vpop.f32.mrb[21].mxu0  ;;  %725 = vst [vmem:[%s1926_s4 + $0x1a8] sm:$0xff] %v1711_v53  ;;  %v1720_v58 = vpop.f32.mrb[21].mxu1  ;;  %v830_v59 = vmul.f32 %v1145_v49, %v1145_v49 }
 0x10b   :  { %692 = vst [vmem:[%s1926_s4 + $0xa0] sm:$0xff] %v453_v52  ;;  %v756_v54 = vadd.f32 %v755_v50, %v453_v52  ;;  %v829_v55 = vmul.f32 %v453_v52, %v453_v52  ;;  %v891_v56 = vadd.f32 %v890_v48, %v828_v46  ;;  %724 = vst [vmem:[%s1926_s4 + $0x1a0] sm:$0xff] %v1720_v58 }
 0x10d   :  { %v892_v60 = vadd.f32 %v891_v56, %v829_v55  ;;  %v1148_v62 = vpop.f32.mrb[22].mxu0  ;;  %v757_v63 = vadd.f32 %v1145_v49, %v756_v54  ;;  %v1729_v1 = vpop.f32.mrb[22].mxu1 }
 0x10e   :  { %695 = vst [vmem:[%s1926_s4 + $0xb8] sm:$0xff] %v1148_v62  ;;  %v463_v0 = vpop.f32.mrb[23].mxu0  ;;  %727 = vst [vmem:[%s1926_s4 + $0x1b8] sm:$0xff] %v1729_v1  ;;  %v1738_v6 = vpop.f32.mrb[23].mxu1  ;;  %v832_v8 = vmul.f32 %v1148_v62, %v1148_v62 }
 0x10f   :  { %694 = vst [vmem:[%s1926_s4 + $0xb0] sm:$0xff] %v463_v0  ;;  %v758_v2 = vadd.f32 %v757_v63, %v463_v0  ;;  %v831_v4 = vmul.f32 %v463_v0, %v463_v0  ;;  %v893_v5 = vadd.f32 %v892_v60, %v830_v59  ;;  %726 = vst [vmem:[%s1926_s4 + $0x1b0] sm:$0xff] %v1738_v6 }
 0x111   :  { %v894_v9 = vadd.f32 %v893_v5, %v831_v4  ;;  %v1151_v10 = vpop.f32.mrb[24].mxu0  ;;  %v759_v12 = vadd.f32 %v1148_v62, %v758_v2  ;;  %v1747_v16 = vpop.f32.mrb[24].mxu1 }
 0x112   :  { %697 = vst [vmem:[%s1926_s4 + $0xc8] sm:$0xff] %v1151_v10  ;;  %v473_v13 = vpop.f32.mrb[25].mxu0  ;;  %729 = vst [vmem:[%s1926_s4 + $0x1c8] sm:$0xff] %v1747_v16  ;;  %v1756_v23 = vpop.f32.mrb[25].mxu1  ;;  %v834_v24 = vmul.f32 %v1151_v10, %v1151_v10 }
 0x113   :  { %696 = vst [vmem:[%s1926_s4 + $0xc0] sm:$0xff] %v473_v13  ;;  %v760_v17 = vadd.f32 %v759_v12, %v473_v13  ;;  %v833_v19 = vmul.f32 %v473_v13, %v473_v13  ;;  %v895_v22 = vadd.f32 %v894_v9, %v832_v8  ;;  %728 = vst [vmem:[%s1926_s4 + $0x1c0] sm:$0xff] %v1756_v23 }
 0x114   :  { %v841_v12 = vmul.f32 %v1540_v14, %v1540_v14 }
 0x115   :  { %v896_v25 = vadd.f32 %v895_v22, %v833_v19  ;;  %v1154_v26 = vpop.f32.mrb[26].mxu0  ;;  %v761_v29 = vadd.f32 %v1151_v10, %v760_v17  ;;  %v1765_v32 = vpop.f32.mrb[26].mxu1  ;;  %v842_v19 = vmul.f32 %v1531_v11, %v1531_v11 }
 0x116   :  { %699 = vst [vmem:[%s1926_s4 + $0xd8] sm:$0xff] %v1154_v26  ;;  %v483_v30 = vpop.f32.mrb[27].mxu0  ;;  %731 = vst [vmem:[%s1926_s4 + $0x1d8] sm:$0xff] %v1765_v32  ;;  %v1774_v38 = vpop.f32.mrb[27].mxu1  ;;  %v836_v39 = vmul.f32 %v1154_v26, %v1154_v26 }
 0x117   :  { %698 = vst [vmem:[%s1926_s4 + $0xd0] sm:$0xff] %v483_v30  ;;  %v762_v34 = vadd.f32 %v761_v29, %v483_v30  ;;  %v835_v35 = vmul.f32 %v483_v30, %v483_v30  ;;  %v897_v36 = vadd.f32 %v896_v25, %v834_v24  ;;  %730 = vst [vmem:[%s1926_s4 + $0x1d0] sm:$0xff] %v1774_v38 }
 0x118   :  { %v843_v25 = vmul.f32 %v1558_v21, %v1558_v21  ;;  %v844_v30 = vmul.f32 %v1549_v18, %v1549_v18 }
 0x119   :  { %v898_v42 = vadd.f32 %v897_v36, %v835_v35  ;;  %v1157_v43 = vpop.f32.mrb[28].mxu0  ;;  %v763_v44 = vadd.f32 %v1154_v26, %v762_v34  ;;  %v1783_v48 = vpop.f32.mrb[28].mxu1 }
 0x11a   :  { %701 = vst [vmem:[%s1926_s4 + $0xe8] sm:$0xff] %v1157_v43  ;;  %v493_v46 = vpop.f32.mrb[29].mxu0  ;;  %733 = vst [vmem:[%s1926_s4 + $0x1e8] sm:$0xff] %v1783_v48  ;;  %v1792_v54 = vpop.f32.mrb[29].mxu1  ;;  %v838_v55 = vmul.f32 %v1157_v43, %v1157_v43 }
 0x11b   :  { %700 = vst [vmem:[%s1926_s4 + $0xe0] sm:$0xff] %v493_v46  ;;  %v764_v49 = vadd.f32 %v763_v44, %v493_v46  ;;  %v837_v50 = vmul.f32 %v493_v46, %v493_v46  ;;  %v899_v52 = vadd.f32 %v898_v42, %v836_v39  ;;  %732 = vst [vmem:[%s1926_s4 + $0x1e0] sm:$0xff] %v1792_v54 }
 0x11d   :  { %v900_v56 = vadd.f32 %v899_v52, %v837_v50  ;;  %v1160_v59 = vpop.f32.mrb[30].mxu0  ;;  %v765_v60 = vadd.f32 %v1157_v43, %v764_v49  ;;  %v1801_v63 = vpop.f32.mrb[30].mxu1 }
 0x11e   :  { %703 = vst [vmem:[%s1926_s4 + $0xf8] sm:$0xff] %v1160_v59  ;;  %v503_v62 = vpop.f32.mrb[31].mxu0  ;;  %735 = vst [vmem:[%s1926_s4 + $0x1f8] sm:$0xff] %v1801_v63  ;;  %v1810_v5 = vpop.f32.mrb[31].mxu1  ;;  %v840_v8 = vmul.f32 %v1160_v59, %v1160_v59 }
 0x11f   :  { %702 = vst [vmem:[%s1926_s4 + $0xf0] sm:$0xff] %v503_v62  ;;  %v766_v0 = vadd.f32 %v765_v60, %v503_v62  ;;  %v839_v2 = vmul.f32 %v503_v62, %v503_v62  ;;  %v901_v4 = vadd.f32 %v900_v56, %v838_v55  ;;  %734 = vst [vmem:[%s1926_s4 + $0x1f0] sm:$0xff] %v1810_v5 }
 0x121   :  { %v767_v9 = vadd.f32 %v1160_v59, %v766_v0  ;;  %v902_v10 = vadd.f32 %v901_v4, %v839_v2 }
 0x123   :  { %v903_v13 = vadd.f32 %v902_v10, %v840_v8  ;;  %v768_v17 = vadd.f32 %v767_v9, %v1540_v14  ;;  %v845_v14 = vmul.f32 %v1576_v31, %v1576_v31 }
 0x125   :  { %v904_v22 = vadd.f32 %v903_v13, %v841_v12  ;;  %v769_v24 = vadd.f32 %v1531_v11, %v768_v17  ;;  %v846_v11 = vmul.f32 %v1567_v27, %v1567_v27 }
 0x127   :  { %v770_v26 = vadd.f32 %v769_v24, %v1558_v21  ;;  %v905_v29 = vadd.f32 %v904_v22, %v842_v19  ;;  %v847_v21 = vmul.f32 %v1594_v41, %v1594_v41 }
 0x129   :  { %v906_v34 = vadd.f32 %v905_v29, %v843_v25  ;;  %v771_v35 = vadd.f32 %v1549_v18, %v770_v26  ;;  %v848_v18 = vmul.f32 %v1585_v37, %v1585_v37 }
 0x12b   :  { %v772_v36 = vadd.f32 %v771_v35, %v1576_v31  ;;  %v907_v39 = vadd.f32 %v906_v34, %v844_v30  ;;  %v849_v31 = vmul.f32 %v1612_v51, %v1612_v51 }
 0x12d   :  { %v908_v42 = vadd.f32 %v907_v39, %v845_v14  ;;  %v773_v43 = vadd.f32 %v1567_v27, %v772_v36  ;;  %v850_v27 = vmul.f32 %v1603_v47, %v1603_v47 }
 0x12f   :  { %v774_v44 = vadd.f32 %v773_v43, %v1594_v41  ;;  %v909_v46 = vadd.f32 %v908_v42, %v846_v11  ;;  %v851_v41 = vmul.f32 %v1630_v61, %v1630_v61 }
 0x131   :  { %v910_v49 = vadd.f32 %v909_v46, %v847_v21  ;;  %v775_v50 = vadd.f32 %v1585_v37, %v774_v44  ;;  %v852_v37 = vmul.f32 %v1621_v57, %v1621_v57 }
 0x133   :  { %v776_v52 = vadd.f32 %v775_v50, %v1612_v51  ;;  %v911_v55 = vadd.f32 %v910_v49, %v848_v18  ;;  %v853_v51 = vmul.f32 %v1648_v7, %v1648_v7 }
 0x135   :  { %v912_v56 = vadd.f32 %v911_v55, %v849_v31  ;;  %v777_v59 = vadd.f32 %v1603_v47, %v776_v52  ;;  %v854_v47 = vmul.f32 %v1639_v3, %v1639_v3 }
 0x137   :  { %v778_v60 = vadd.f32 %v777_v59, %v1630_v61  ;;  %v913_v62 = vadd.f32 %v912_v56, %v850_v27  ;;  %v855_v61 = vmul.f32 %v1666_v20, %v1666_v20 }
 0x139   :  { %v914_v0 = vadd.f32 %v913_v62, %v851_v41  ;;  %v779_v2 = vadd.f32 %v1621_v57, %v778_v60  ;;  %v856_v57 = vmul.f32 %v1657_v15, %v1657_v15 }
 0x13b   :  { %v780_v4 = vadd.f32 %v779_v2, %v1648_v7  ;;  %v915_v8 = vadd.f32 %v914_v0, %v852_v37  ;;  %v857_v7 = vmul.f32 %v1684_v33, %v1684_v33 }
 0x13d   :  { %v916_v9 = vadd.f32 %v915_v8, %v853_v51  ;;  %v781_v10 = vadd.f32 %v1639_v3, %v780_v4  ;;  %v858_v3 = vmul.f32 %v1675_v28, %v1675_v28 }
 0x13f   :  { %v782_v12 = vadd.f32 %v781_v10, %v1666_v20  ;;  %v917_v13 = vadd.f32 %v916_v9, %v854_v47  ;;  %v859_v20 = vmul.f32 %v1702_v45, %v1702_v45 }
 0x141   :  { %v918_v17 = vadd.f32 %v917_v13, %v855_v61  ;;  %v783_v19 = vadd.f32 %v1657_v15, %v782_v12  ;;  %v860_v15 = vmul.f32 %v1693_v40, %v1693_v40  ;;  %v736_v13 = vld [vmem:[#allocation2] sm:$0x1] }
 0x143   :  { %v784_v22 = vadd.f32 %v783_v19, %v1684_v33  ;;  %v919_v24 = vadd.f32 %v918_v17, %v856_v57  ;;  %v861_v33 = vmul.f32 %v1720_v58, %v1720_v58  ;;  %v808_v17 = vld [vmem:[#allocation3] sm:$0x1] }
 0x145   :  { %v920_v25 = vadd.f32 %v919_v24, %v857_v7  ;;  %v785_v26 = vadd.f32 %v1675_v28, %v784_v22  ;;  %v862_v28 = vmul.f32 %v1711_v53, %v1711_v53 }
 0x147   :  { %v786_v29 = vadd.f32 %v785_v26, %v1702_v45  ;;  %v921_v30 = vadd.f32 %v920_v25, %v858_v3  ;;  %v863_v45 = vmul.f32 %v1738_v6, %v1738_v6 }
 0x149   :  { %v922_v34 = vadd.f32 %v921_v30, %v859_v20  ;;  %v787_v35 = vadd.f32 %v1693_v40, %v786_v29  ;;  %v864_v40 = vmul.f32 %v1729_v1, %v1729_v1  ;;  %v953_v30 = vld [vmem:[%s1927_s2] sm:$0x1] }
 0x14b   :  { %v788_v14 = vadd.f32 %v787_v35, %v1720_v58  ;;  %v923_v36 = vadd.f32 %v922_v34, %v860_v15  ;;  %v865_v58 = vmul.f32 %v1756_v23, %v1756_v23  ;;  %v957_v35 = vld [vmem:[%s1928_s3] sm:$0x1] }
 0x14d   :  { %v924_v39 = vadd.f32 %v923_v36, %v861_v33  ;;  %v789_v11 = vadd.f32 %v1711_v53, %v788_v14  ;;  %v866_v53 = vmul.f32 %v1747_v16, %v1747_v16 }
 0x14f   :  { %v790_v42 = vadd.f32 %v789_v11, %v1738_v6  ;;  %v925_v43 = vadd.f32 %v924_v39, %v862_v28  ;;  %v867_v6 = vmul.f32 %v1774_v38, %v1774_v38 }
 0x151   :  { %v926_v21 = vadd.f32 %v925_v43, %v863_v45  ;;  %v791_v44 = vadd.f32 %v1729_v1, %v790_v42  ;;  %v868_v1 = vmul.f32 %v1765_v32, %v1765_v32 }
 0x153   :  { %v792_v46 = vadd.f32 %v791_v44, %v1756_v23  ;;  %v927_v18 = vadd.f32 %v926_v21, %v864_v40  ;;  %v869_v23 = vmul.f32 %v1792_v54, %v1792_v54 }
 0x155   :  { %v928_v49 = vadd.f32 %v927_v18, %v865_v58  ;;  %v793_v50 = vadd.f32 %v1747_v16, %v792_v46  ;;  %v870_v16 = vmul.f32 %v1783_v48, %v1783_v48 }
 0x157   :  { %v794_v31 = vadd.f32 %v793_v50, %v1774_v38  ;;  %v929_v52 = vadd.f32 %v928_v49, %v866_v53  ;;  %v871_v38 = vmul.f32 %v1810_v5, %v1810_v5 }
 0x159   :  { %v930_v55 = vadd.f32 %v929_v52, %v867_v6  ;;  %v795_v27 = vadd.f32 %v1765_v32, %v794_v31  ;;  %v872_v32 = vmul.f32 %v1801_v63, %v1801_v63 }
 0x15b   :  { %v796_v56 = vadd.f32 %v795_v27, %v1792_v54  ;;  %v931_v59 = vadd.f32 %v930_v55, %v868_v1 }
 0x15d   :  { %v932_v41 = vadd.f32 %v931_v59, %v869_v23  ;;  %v797_v60 = vadd.f32 %v1783_v48, %v796_v56 }
 0x15f   :  { %v798_v62 = vadd.f32 %v797_v60, %v1810_v5  ;;  %v933_v37 = vadd.f32 %v932_v41, %v870_v16 }
 0x161   :  { %v799_v0 = vadd.f32 %v1801_v63, %v798_v62  ;;  %v934_v2 = vadd.f32 %v933_v37, %v871_v38 }
 0x163   :  { %v800_v54 = vrot.slane %v799_v0, 4  ;;  %v935_v51 = vadd.f32 %v934_v2, %v872_v32 }
 0x165   :  { %v801_v4 = vadd.f32 %v800_v54, %v799_v0  ;;  %v936_v8 = vrot.slane %v935_v51, 4 }
 0x167   :  { %v802_v47 = vrot.slane %v801_v4, 2  ;;  %v937_v9 = vadd.f32 %v936_v8, %v935_v51 }
 0x169   :  { %v803_v10 = vadd.f32 %v802_v47, %v801_v4  ;;  %v938_v48 = vrot.slane %v937_v9, 2 }
 0x16b   :  { %v804_v61 = vrot.slane %v803_v10, 1  ;;  %v939_v12 = vadd.f32 %v938_v48, %v937_v9 }
 0x16d   :  { %v805_v57 = vadd.f32 %v804_v61, %v803_v10  ;;  %v940_v5 = vrot.slane %v939_v12, 1 }
 0x16f   :  { %v806_v19 = vadd.f32 %v805_v57, %v736_v13  ;;  %v941_v7 = vadd.f32 %v940_v5, %v939_v12 }
 0x171   :  { %807 = vst [vmem:[#allocation2] sm:$0x1] %v806_v19  ;;  %v942_v22 = vadd.f32 %v941_v7, %v808_v17 }
 0x173   :  { %943 = vst [vmem:[#allocation3] sm:$0x1] %v942_v22 }
 0x178   :  { %v947_v63 = vld [vmem:[#allocation2] sm:$0x1] }
 0x179   :  { %v948_v24 = vmul.f32 0.001953125, %v947_v63 }
 0x17a   :  { %v949_v3 = vld [vmem:[#allocation3] sm:$0x1] }
 0x17b   :  { %v950_v25 = vmul.f32 0.001953125, %v949_v3  ;;  %v951_v26 = vmul.f32 %v948_v24, %v948_v24 }
 0x17d   :  { %v952_v20 = vsub.f32 %v950_v25, %v951_v26 }
 0x17f   :  { %v954_v29 = vadd.f32 1e-05, %v952_v20 }
 0x181   :  { %1224 = vrsqrt.f32 %v954_v29 }
 0x18b   :  { %v1225_v15 = vpop.eup %1224 }
 0x18c   :  { %v956_v34 = vmul.f32 %v1225_v15, %v953_v30 }
 0x18e   :  { %v958_v33 = vmul.f32 %v956_v34, %v948_v24  ;;  %960 = vst [vmem:[%s1929_s5] sm:$0x1] %v956_v34 }
 0x190   :  { %v959_v14 = vsub.f32 %v957_v35, %v958_v33 }
 0x192   :  { %961 = vst [vmem:[%s1929_s5 + $0x1] sm:$0x1] %v959_v14 }

</bundles_post_ra>
